<compile_context>
chip_gen: v7x
topology: tpu7x:2x2x1
jax: 0.10.0
libtpu: 0.0.40
codegen_flags: <defaults>
</compile_context>

<pallas_src>
import functools

import jax
import jax.numpy as jnp
from jax.experimental import pallas as pl
from jax.experimental.pallas import tpu as pltpu


def _round_up(x, m):
    return (x + m - 1) // m * m


# ----------------------------------------------------------------------------
# Pallas kernels
# ----------------------------------------------------------------------------

def _gemm_bias_relu_kernel(a_ref, w_ref, b_ref, o_ref, acc_ref):
    # a: (tm, tk) bf16, w: (tk, Og) bf16, b: (1, Og) f32  ->  o: (tm, Og) f32
    # Grid = (groups, M-tiles, K-tiles); K is the innermost ("arbitrary") axis.
    @pl.when(pl.program_id(2) == 0)
    def _():
        acc_ref[...] = jnp.zeros_like(acc_ref)

    acc_ref[...] += jnp.dot(a_ref[...], w_ref[...],
                            preferred_element_type=jnp.float32)

    @pl.when(pl.program_id(2) == pl.num_programs(2) - 1)
    def _():
        o_ref[...] = jnp.maximum(acc_ref[...] + b_ref[...], 0.0
                                 ).astype(o_ref.dtype)


def _gemm_bias_relu_1x1_kernel(a_ref, w_ref, b_ref, w2_ref, b2_ref, o_ref,
                               acc_ref):
    # Same as above, but the epilogue also applies a fused 1x1 conv
    # (conv3 -> ReLU -> conv4 -> ReLU) before storing only the narrow result.
    @pl.when(pl.program_id(2) == 0)
    def _():
        acc_ref[...] = jnp.zeros_like(acc_ref)

    acc_ref[...] += jnp.dot(a_ref[...], w_ref[...],
                            preferred_element_type=jnp.float32)

    @pl.when(pl.program_id(2) == pl.num_programs(2) - 1)
    def _():
        h = jnp.maximum(acc_ref[...] + b_ref[...], 0.0)        # conv3 + ReLU
        o = jnp.dot(h, w2_ref[...], preferred_element_type=jnp.float32)
        o_ref[...] = jnp.maximum(o + b2_ref[...], 0.0).astype(o_ref.dtype)


def _pool_lrn_kernel(ee_ref, eo_ref, oe_ref, oo_ref, o_ref, *,
                     size, alpha, beta, k):
    # Fused MaxPool(3x3, stride 2) + CrossMapLRN2d on one batch element.
    # Inputs are the four (H-parity, W-parity) planes of the feature map, so
    # the 9 pooling taps are contiguous slices (no strided loads, no HBM tap
    # stack).  The LRN channel window is built with lane rolls + masks.
    ee = ee_ref[0]                                   # (ho+1, wo+1, c)
    eo = eo_ref[0]                                   # (ho+1, wo,   c)
    oe = oe_ref[0]                                   # (ho,   wo+1, c)
    oo = oo_ref[0]                                   # (ho,   wo,   c)
    ho, wo, c = oo.shape

    m = oo                                           # tap (2r+1, 2q+1)
    m = jnp.maximum(m, ee[:ho, :wo])                 # (2r,   2q)
    m = jnp.maximum(m, ee[:ho, 1:wo + 1])            # (2r,   2q+2)
    m = jnp.maximum(m, ee[1:ho + 1, :wo])            # (2r+2, 2q)
    m = jnp.maximum(m, ee[1:ho + 1, 1:wo + 1])       # (2r+2, 2q+2)
    m = jnp.maximum(m, eo[:ho])                      # (2r,   2q+1)
    m = jnp.maximum(m, eo[1:ho + 1])                 # (2r+2, 2q+1)
    m = jnp.maximum(m, oe[:, :wo])                   # (2r+1, 2q)
    m = jnp.maximum(m, oe[:, 1:wo + 1])              # (2r+1, 2q+2)

    # Cross-map LRN: sum of squares over a +-(size//2) channel window (clipped
    # at the edges), built in-register with rolls along the lane axis.
    sq = m * m
    half = size // 2
    cid = jax.lax.broadcasted_iota(jnp.int32, sq.shape, 2)
    acc = sq
    for off in range(1, half + 1):
        up = pltpu.roll(sq, shift=c - off, axis=2)   # channel ch+off -> ch
        acc = acc + jnp.where(cid < c - off, up, 0.0)
        dn = pltpu.roll(sq, shift=off, axis=2)       # channel ch-off -> ch
        acc = acc + jnp.where(cid >= off, dn, 0.0)

    base = k + (alpha / size) * acc                  # base >= k = 1 > 0
    o_ref[0] = (m * jnp.exp(-beta * jnp.log(base))).astype(o_ref.dtype)


# ----------------------------------------------------------------------------
# Pallas wrappers
# ----------------------------------------------------------------------------

def _grouped_gemm_bias_relu(a, w, b, *, w2=None, b2=None, tm=256, tk=128):
    """relu(a @ w + b) per group, optionally fused with a 1x1 second layer.

    a: (G, M, K) f32 im2col patches (channel-major K ordering)
    w: (G, K, Og) f32, b: (G, Og) f32
    w2/b2 (optional, G must be 1): (Og, O2) / (O2,)
    returns (G, M, Oout) f32.
    For production-size inputs raise tm (512 on v7x, 1024+ on v6e/v5e).
    """
    gdim, m, kdim = a.shape
    og = w.shape[2]
    tm = min(tm, _round_up(m, 8))
    mp = _round_up(m, tm)
    kp = _round_up(kdim, tk)

    # bf16 operands for the MXU; zero padding contributes nothing to the dot.
    a = jnp.pad(a, ((0, 0), (0, mp - m), (0, kp - kdim))).astype(jnp.bfloat16)
    w = jnp.pad(w, ((0, 0), (0, kp - kdim), (0, 0))).astype(jnp.bfloat16)
    b = b.reshape(gdim, 1, og).astype(jnp.float32)

    a_spec = pl.BlockSpec((None, tm, tk), lambda g, i, kk: (g, i, kk))
    w_spec = pl.BlockSpec((None, tk, og), lambda g, i, kk: (g, kk, 0))
    b_spec = pl.BlockSpec((None, 1, og), lambda g, i, kk: (g, 0, 0))

    if w2 is None:
        kernel = _gemm_bias_relu_kernel
        o_ch = og
        extra_args, extra_specs = (), []
    else:
        assert gdim == 1, "1x1 fusion only supported for ungrouped convs"
        o_ch = w2.shape[1]
        kernel = _gemm_bias_relu_1x1_kernel
        extra_args = (w2.astype(jnp.float32),
                      b2.reshape(1, o_ch).astype(jnp.float32))
        extra_specs = [pl.BlockSpec((og, o_ch), lambda g, i, kk: (0, 0)),
                       pl.BlockSpec((1, o_ch), lambda g, i, kk: (0, 0))]

    o_spec = pl.BlockSpec((None, tm, o_ch), lambda g, i, kk: (g, i, 0))

    out = pl.pallas_call(
        kernel,
        out_shape=jax.ShapeDtypeStruct((gdim, mp, o_ch), jnp.float32),
        grid_spec=pltpu.PrefetchScalarGridSpec(
            num_scalar_prefetch=0,
            grid=(gdim, mp // tm, kp // tk),
            in_specs=[a_spec, w_spec, b_spec] + extra_specs,
            out_specs=o_spec,
            scratch_shapes=[pltpu.VMEM((tm, og), jnp.float32)]),
        compiler_params=pltpu.CompilerParams(
            dimension_semantics=("parallel", "parallel", "arbitrary"),
            vmem_limit_bytes=32 * 1024 * 1024),
    )(a, w, b, *extra_args)
    return out[:, :m]


def maxpool_lrn(x, *, size=5, alpha=1e-4, beta=0.75, k=1.0):
    """Fused MaxPool2d(3, stride=2) + CrossMapLRN2d(size, alpha, beta, k)."""
    n, h, w, c = x.shape
    ho = (h - 3) // 2 + 1
    wo = (w - 3) // 2 + 1
    # One-pass parity split of the spatial dims (plain XLA, ~1x traffic); the
    # nine stride-2 pooling taps then become contiguous slices in the kernel.
    xee = x[:, 0::2, 0::2, :][:, :ho + 1, :wo + 1, :]
    xeo = x[:, 0::2, 1::2, :][:, :ho + 1, :wo, :]
    xoe = x[:, 1::2, 0::2, :][:, :ho, :wo + 1, :]
    xoo = x[:, 1::2, 1::2, :][:, :ho, :wo, :]

    kern = functools.partial(_pool_lrn_kernel,
                             size=size, alpha=alpha, beta=beta, k=k)

    def spec(hh, ww):
        return pl.BlockSpec((1, hh, ww, c), lambda i: (i, 0, 0, 0))

    return pl.pallas_call(
        kern,
        out_shape=jax.ShapeDtypeStruct((n, ho, wo, c), x.dtype),
        grid=(n,),
        in_specs=[spec(ho + 1, wo + 1), spec(ho + 1, wo),
                  spec(ho, wo + 1), spec(ho, wo)],
        out_specs=spec(ho, wo),
        compiler_params=pltpu.CompilerParams(
            dimension_semantics=("parallel",)),
    )(xee, xeo, xoe, xoo)


# ----------------------------------------------------------------------------
# Plain-JAX glue: im2col (layout plumbing only)
# ----------------------------------------------------------------------------

# TODO(synk): lower the 5x5 conv as an in-kernel kh*kw tap-accumulation grid
# reading NHWC directly (instead of XLA-side im2col) to cut the patch-expansion
# HBM traffic further.
def _im2col(x, kh, kw, stride, pad):
    # x: (N, H, W, C) NHWC -> patches (N, Ho, Wo, C*kh*kw), flattened in
    # (C, kh, kw) order so it matches torch weight.reshape(O, C*kh*kw).
    if pad:
        x = jnp.pad(x, ((0, 0), (pad, pad), (pad, pad), (0, 0)))
    n, h, w, c = x.shape
    ho = (h - kh) // stride + 1
    wo = (w - kw) // stride + 1
    cols = []
    for i in range(kh):
        for j in range(kw):
            cols.append(
                x[:, i:i + stride * (ho - 1) + 1:stride,
                     j:j + stride * (wo - 1) + 1:stride, :]
            )
    patches = jnp.stack(cols, axis=-1)            # (N, Ho, Wo, C, kh*kw)
    patches = patches.reshape(n, ho, wo, c * kh * kw)
    return patches, ho, wo


def conv2d_relu(x, w, b, *, stride, pad, groups=1, w2=None, b2=None,
                tm=256, tk=128):
    # x: NHWC f32; w: torch layout (O, Cin/groups, kh, kw); b: (O,).
    # Optional w2/b2 fuse a following 1x1 conv + ReLU into the GEMM epilogue.
    o_total, cg, kh, kw = w.shape
    n, _, _, cin = x.shape
    og = o_total // groups
    assert cin == cg * groups

    patches, ho, wo = _im2col(x, kh, kw, stride, pad)     # (N,Ho,Wo,Cin*kh*kw)
    m = n * ho * wo
    kg = cg * kh * kw
    # K is channel-major, so each group's K block is contiguous.
    a = patches.reshape(m, groups, kg).transpose(1, 0, 2)       # (G, M, Kg)
    wg = w.reshape(groups, og, kg).transpose(0, 2, 1)           # (G, Kg, Og)
    bg = b.reshape(groups, og)

    out = _grouped_gemm_bias_relu(a, wg, bg, w2=w2, b2=b2, tm=tm, tk=tk)
    oc = out.shape[-1]
    if groups == 1:
        out = out[0]
    else:
        # Interleave the per-group outputs back to contiguous NHWC channels
        # (matches torch grouped-conv output ordering).
        out = jnp.transpose(out, (1, 0, 2)).reshape(m, groups * oc)
    return out.reshape(n, ho, wo, groups * oc)


# ----------------------------------------------------------------------------
# Model: ItrackerImageModel forward
# ----------------------------------------------------------------------------

def init_params(key):
    def conv_init(key, o, c, kh, kw):
        kw_, kb_ = jax.random.split(key)
        fan_in = c * kh * kw
        scale = 1.0 / jnp.sqrt(fan_in)
        w = jax.random.normal(kw_, (o, c, kh, kw), jnp.float32) * scale
        b = jax.random.uniform(kb_, (o,), jnp.float32, -scale, scale)
        return w, b

    k1, k2, k3, k4 = jax.random.split(key, 4)
    w1, b1 = conv_init(k1, 32, 1, 11, 11)          # Conv2d(1, 32, 11, s=4)
    w2, b2 = conv_init(k2, 64, 16, 5, 5)           # Conv2d(32, 64, 5, p=2, g=2)
    w3, b3 = conv_init(k3, 32, 64, 3, 3)           # Conv2d(64, 32, 3, p=1)
    w4, b4 = conv_init(k4, 16, 32, 1, 1)           # Conv2d(32, 16, 1)
    return dict(w1=w1, b1=b1, w2=w2, b2=b2, w3=w3, b3=b3, w4=w4, b4=b4)


def itracker_image_forward(x_nchw, params):
    # NCHW -> NHWC
    x = jnp.transpose(x_nchw, (0, 2, 3, 1))
    x = conv2d_relu(x, params["w1"], params["b1"], stride=4, pad=0)
    x = maxpool_lrn(x)                                    # pool + LRN fused
    x = conv2d_relu(x, params["w2"], params["b2"], stride=1, pad=2, groups=2)
    x = maxpool_lrn(x)                                    # pool + LRN fused
    # conv3 (3x3) with conv4 (1x1) fused into the GEMM epilogue.
    w4 = params["w4"].reshape(16, 32).T                   # (32, 16)
    x = conv2d_relu(x, params["w3"], params["b3"], stride=1, pad=1,
                    w2=w4, b2=params["b4"])
    # flatten in NCHW order to match PyTorch's x.view(x.size(0), -1)
    x = jnp.transpose(x, (0, 3, 1, 2))
    return x.reshape(x.shape[0], -1)


if __name__ == "__main__":
    key = jax.random.PRNGKey(0)
    kp, kx = jax.random.split(key)
    params = init_params(kp)

    # Smallest clean input that survives the two stride-2 max-pools:
    # 63 -> conv1(11,s4): 14 -> pool: 6 -> conv2(p2): 6 -> pool: 2 -> conv3/4: 2
    x = jax.random.normal(kx, (2, 1, 63, 63), jnp.float32)

    fwd = jax.jit(lambda inp: itracker_image_forward(inp, params))
    out = fwd(x)
    out = jax.block_until_ready(out)

    assert out.shape == (2, 16 * 2 * 2), out.shape
    assert bool(jnp.all(jnp.isfinite(out)))
    print("KERNEL_OK")
</pallas_src>

<mosaic_0001>
module attributes {stable_mosaic.version = 11 : i64} {
  func.func @_gemm_bias_relu_kernel(%arg0: i32, %arg1: i32, %arg2: i32, %arg3: memref<1x256x128xbf16, #tpu.memory_space<vmem>>, %arg4: memref<1x128x32xbf16, #tpu.memory_space<vmem>>, %arg5: memref<1x1x32xf32, #tpu.memory_space<vmem>>, %arg6: memref<1x256x32xf32, #tpu.memory_space<vmem>>, %arg7: memref<256x32xf32, #tpu.memory_space<vmem>>) attributes {dimension_semantics = [#tpu.dimension_semantics<parallel>, #tpu.dimension_semantics<parallel>, #tpu.dimension_semantics<arbitrary>], iteration_bounds = array<i64: 1, 2, 1>, scalar_prefetch = 0 : i64, scratch_operands = 1 : i64, tpu.core_type = #tpu.core_type<tc>, window_params = [{transform_indices = @transform_0, window_bounds = array<i64: 1, 256, 128>}, {transform_indices = @transform_1, window_bounds = array<i64: 1, 128, 32>}, {transform_indices = @transform_2, window_bounds = array<i64: 1, 1, 32>}, {transform_indices = @transform_3, window_bounds = array<i64: 1, 256, 32>}]} {
    %c0_i32 = arith.constant 0 : i32
    %0 = arith.cmpi eq, %arg2, %c0_i32 : i32
    %1 = arith.extui %0 : i1 to i32
    %c0_i32_0 = arith.constant 0 : i32
    %2 = arith.cmpi ne, %1, %c0_i32_0 : i32
    scf.if %2 {
      %cst_12 = arith.constant 0.000000e+00 : f32
      %14 = vector.broadcast %cst_12 : f32 to vector<256x32xf32>
      %c0_13 = arith.constant 0 : index
      %c0_14 = arith.constant 0 : index
      %15 = vector.load %arg7[%c0_13, %c0_14] : memref<256x32xf32, #tpu.memory_space<vmem>>, vector<256x32xf32>
      tpu.vector_store %arg7[%c0_13, %c0_14], %14 {strides = array<i32>} : memref<256x32xf32, #tpu.memory_space<vmem>>, vector<256x32xf32>,
    } else {
    }
    %c0 = arith.constant 0 : index
    %c0_1 = arith.constant 0 : index
    %3 = vector.load %arg7[%c0, %c0_1] : memref<256x32xf32, #tpu.memory_space<vmem>>, vector<256x32xf32>
    %c0_2 = arith.constant 0 : index
    %c0_3 = arith.constant 0 : index
    %c0_4 = arith.constant 0 : index
    %4 = vector.load %arg3[%c0_2, %c0_3, %c0_4] : memref<1x256x128xbf16, #tpu.memory_space<vmem>>, vector<1x256x128xbf16>
    %5 = vector.shape_cast %4 : vector<1x256x128xbf16> to vector<256x128xbf16>
    %c0_5 = arith.constant 0 : index
    %c0_6 = arith.constant 0 : index
    %c0_7 = arith.constant 0 : index
    %6 = vector.load %arg4[%c0_5, %c0_6, %c0_7] : memref<1x128x32xbf16, #tpu.memory_space<vmem>>, vector<1x128x32xbf16>
    %7 = vector.shape_cast %6 : vector<1x128x32xbf16> to vector<128x32xbf16>
    %cst = arith.constant dense<0.000000e+00> : vector<256x32xf32>
    %8 = tpu.matmul %5, %7, %cst {dimension_numbers = #tpu.dot_dimension_numbers<[1], [0], [0], [1], [0, 0, 1, 1], [], []>} : vector<256x128xbf16>, vector<128x32xbf16>, vector<256x32xf32> -> vector<256x32xf32>
    %9 = arith.addf %3, %8 : vector<256x32xf32>
    %c0_8 = arith.constant 0 : index
    %c0_9 = arith.constant 0 : index
    %10 = vector.load %arg7[%c0_8, %c0_9] : memref<256x32xf32, #tpu.memory_space<vmem>>, vector<256x32xf32>
    tpu.vector_store %arg7[%c0_8, %c0_9], %9 {strides = array<i32>} : memref<256x32xf32, #tpu.memory_space<vmem>>, vector<256x32xf32>,
    %c0_i32_10 = arith.constant 0 : i32
    %11 = arith.cmpi eq, %arg2, %c0_i32_10 : i32
    %12 = arith.extui %11 : i1 to i32
    %c0_i32_11 = arith.constant 0 : i32
    %13 = arith.cmpi ne, %12, %c0_i32_11 : i32
    scf.if %13 {
      %c0_12 = arith.constant 0 : index
      %c0_13 = arith.constant 0 : index
      %14 = vector.load %arg7[%c0_12, %c0_13] : memref<256x32xf32, #tpu.memory_space<vmem>>, vector<256x32xf32>
      %c0_14 = arith.constant 0 : index
      %c0_15 = arith.constant 0 : index
      %c0_16 = arith.constant 0 : index
      %15 = vector.load %arg5[%c0_14, %c0_15, %c0_16] : memref<1x1x32xf32, #tpu.memory_space<vmem>>, vector<1x1x32xf32>
      %16 = vector.shape_cast %15 : vector<1x1x32xf32> to vector<1x32xf32>
      %17 = vector.broadcast %16 : vector<1x32xf32> to vector<256x32xf32>
      %18 = arith.addf %14, %17 : vector<256x32xf32>
      %cst_17 = arith.constant 0.000000e+00 : f32
      %19 = vector.broadcast %cst_17 : f32 to vector<256x32xf32>
      %20 = arith.maximumf %18, %19 : vector<256x32xf32>
      %c0_18 = arith.constant 0 : index
      %c0_19 = arith.constant 0 : index
      %c0_20 = arith.constant 0 : index
      %21 = vector.load %arg6[%c0_18, %c0_19, %c0_20] : memref<1x256x32xf32, #tpu.memory_space<vmem>>, vector<1x256x32xf32>
      %22 = vector.shape_cast %21 : vector<1x256x32xf32> to vector<256x32xf32>
      %23 = vector.shape_cast %20 : vector<256x32xf32> to vector<1x256x32xf32>
      tpu.vector_store %arg6[%c0_18, %c0_19, %c0_20], %23 {strides = array<i32>} : memref<1x256x32xf32, #tpu.memory_space<vmem>>, vector<1x256x32xf32>,
    } else {
    }
    return
  }
  func.func @transform_0(%arg0: i32, %arg1: i32, %arg2: i32) -> (i32, i32, i32) {
    %c0_i32 = arith.constant 0 : i32
    return %arg0, %arg1, %arg2 : i32, i32, i32
  }
  func.func @transform_1(%arg0: i32, %arg1: i32, %arg2: i32) -> (i32, i32, i32) {
    %c0_i32 = arith.constant 0 : i32
    %c0_i32_0 = arith.constant 0 : i32
    return %arg0, %arg2, %c0_i32 : i32, i32, i32
  }
  func.func @transform_2(%arg0: i32, %arg1: i32, %arg2: i32) -> (i32, i32, i32) {
    %c0_i32 = arith.constant 0 : i32
    %c0_i32_0 = arith.constant 0 : i32
    %c0_i32_1 = arith.constant 0 : i32
    return %arg0, %c0_i32, %c0_i32_0 : i32, i32, i32
  }
  func.func @transform_3(%arg0: i32, %arg1: i32, %arg2: i32) -> (i32, i32, i32) {
    %c0_i32 = arith.constant 0 : i32
    %c0_i32_0 = arith.constant 0 : i32
    return %arg0, %arg1, %c0_i32 : i32, i32, i32
  }
}

module attributes {stable_mosaic.version = 11 : i64} {
  func.func @_pool_lrn_kernel(%arg0: i32, %arg1: memref<1x7x7x32xf32, #tpu.memory_space<vmem>>, %arg2: memref<1x7x6x32xf32, #tpu.memory_space<vmem>>, %arg3: memref<1x6x7x32xf32, #tpu.memory_space<vmem>>, %arg4: memref<1x6x6x32xf32, #tpu.memory_space<vmem>>, %arg5: memref<1x6x6x32xf32, #tpu.memory_space<vmem>>) attributes {dimension_semantics = [#tpu.dimension_semantics<parallel>], iteration_bounds = array<i64: 2>, scalar_prefetch = 0 : i64, scratch_operands = 0 : i64, tpu.core_type = #tpu.core_type<tc>, window_params = [{transform_indices = @transform_0, window_bounds = array<i64: 1, 7, 7, 32>}, {transform_indices = @transform_1, window_bounds = array<i64: 1, 7, 6, 32>}, {transform_indices = @transform_2, window_bounds = array<i64: 1, 6, 7, 32>}, {transform_indices = @transform_3, window_bounds = array<i64: 1, 6, 6, 32>}, {transform_indices = @transform_4, window_bounds = array<i64: 1, 6, 6, 32>}]} {
    %c0 = arith.constant 0 : index
    %c0_0 = arith.constant 0 : index
    %c0_1 = arith.constant 0 : index
    %c0_2 = arith.constant 0 : index
    %0 = vector.load %arg1[%c0, %c0_0, %c0_1, %c0_2] : memref<1x7x7x32xf32, #tpu.memory_space<vmem>>, vector<1x7x7x32xf32>
    %1 = vector.shape_cast %0 : vector<1x7x7x32xf32> to vector<7x7x32xf32>
    %c0_3 = arith.constant 0 : index
    %c0_4 = arith.constant 0 : index
    %c0_5 = arith.constant 0 : index
    %c0_6 = arith.constant 0 : index
    %2 = vector.load %arg2[%c0_3, %c0_4, %c0_5, %c0_6] : memref<1x7x6x32xf32, #tpu.memory_space<vmem>>, vector<1x7x6x32xf32>
    %3 = vector.shape_cast %2 : vector<1x7x6x32xf32> to vector<7x6x32xf32>
    %c0_7 = arith.constant 0 : index
    %c0_8 = arith.constant 0 : index
    %c0_9 = arith.constant 0 : index
    %c0_10 = arith.constant 0 : index
    %4 = vector.load %arg3[%c0_7, %c0_8, %c0_9, %c0_10] : memref<1x6x7x32xf32, #tpu.memory_space<vmem>>, vector<1x6x7x32xf32>
    %5 = vector.shape_cast %4 : vector<1x6x7x32xf32> to vector<6x7x32xf32>
    %c0_11 = arith.constant 0 : index
    %c0_12 = arith.constant 0 : index
    %c0_13 = arith.constant 0 : index
    %c0_14 = arith.constant 0 : index
    %6 = vector.load %arg4[%c0_11, %c0_12, %c0_13, %c0_14] : memref<1x6x6x32xf32, #tpu.memory_space<vmem>>, vector<1x6x6x32xf32>
    %7 = vector.shape_cast %6 : vector<1x6x6x32xf32> to vector<6x6x32xf32>
    %8 = vector.extract_strided_slice %1 {offsets = [0, 0, 0], sizes = [6, 6, 32], strides = [1, 1, 1]} : vector<7x7x32xf32> to vector<6x6x32xf32>
    %9 = arith.maximumf %7, %8 : vector<6x6x32xf32>
    %10 = vector.extract_strided_slice %1 {offsets = [0, 1, 0], sizes = [6, 6, 32], strides = [1, 1, 1]} : vector<7x7x32xf32> to vector<6x6x32xf32>
    %11 = arith.maximumf %9, %10 : vector<6x6x32xf32>
    %12 = vector.extract_strided_slice %1 {offsets = [1, 0, 0], sizes = [6, 6, 32], strides = [1, 1, 1]} : vector<7x7x32xf32> to vector<6x6x32xf32>
    %13 = arith.maximumf %11, %12 : vector<6x6x32xf32>
    %14 = vector.extract_strided_slice %1 {offsets = [1, 1, 0], sizes = [6, 6, 32], strides = [1, 1, 1]} : vector<7x7x32xf32> to vector<6x6x32xf32>
    %15 = arith.maximumf %13, %14 : vector<6x6x32xf32>
    %16 = vector.extract_strided_slice %3 {offsets = [0, 0, 0], sizes = [6, 6, 32], strides = [1, 1, 1]} : vector<7x6x32xf32> to vector<6x6x32xf32>
    %17 = arith.maximumf %15, %16 : vector<6x6x32xf32>
    %18 = vector.extract_strided_slice %3 {offsets = [1, 0, 0], sizes = [6, 6, 32], strides = [1, 1, 1]} : vector<7x6x32xf32> to vector<6x6x32xf32>
    %19 = arith.maximumf %17, %18 : vector<6x6x32xf32>
    %20 = vector.extract_strided_slice %5 {offsets = [0, 0, 0], sizes = [6, 6, 32], strides = [1, 1, 1]} : vector<6x7x32xf32> to vector<6x6x32xf32>
    %21 = arith.maximumf %19, %20 : vector<6x6x32xf32>
    %22 = vector.extract_strided_slice %5 {offsets = [0, 1, 0], sizes = [6, 6, 32], strides = [1, 1, 1]} : vector<6x7x32xf32> to vector<6x6x32xf32>
    %23 = arith.maximumf %21, %22 : vector<6x6x32xf32>
    %24 = arith.mulf %23, %23 : vector<6x6x32xf32>
    %25 = tpu.iota {dimensions = array<i32: 2>} : vector<6x6x32xi32>
    %c31_i32 = arith.constant 31 : i32
    %26 = tpu.dynamic_rotate %24 by %c31_i32 dim 2 : vector<6x6x32xf32>, i32 -> vector<6x6x32xf32>
    %c31_i32_15 = arith.constant 31 : i32
    %27 = vector.broadcast %c31_i32_15 : i32 to vector<6x6x32xi32>
    %28 = arith.cmpi slt, %25, %27 : vector<6x6x32xi32>
    %cst = arith.constant 0.000000e+00 : f32
    %29 = vector.broadcast %cst : f32 to vector<6x6x32xf32>
    %30 = arith.select %28, %26, %29 : vector<6x6x32xi1>, vector<6x6x32xf32>
    %31 = arith.addf %24, %30 : vector<6x6x32xf32>
    %c1_i32 = arith.constant 1 : i32
    %32 = tpu.dynamic_rotate %24 by %c1_i32 dim 2 : vector<6x6x32xf32>, i32 -> vector<6x6x32xf32>
    %c1_i32_16 = arith.constant 1 : i32
    %33 = vector.broadcast %c1_i32_16 : i32 to vector<6x6x32xi32>
    %34 = arith.cmpi sge, %25, %33 : vector<6x6x32xi32>
    %cst_17 = arith.constant 0.000000e+00 : f32
    %35 = vector.broadcast %cst_17 : f32 to vector<6x6x32xf32>
    %36 = arith.select %34, %32, %35 : vector<6x6x32xi1>, vector<6x6x32xf32>
    %37 = arith.addf %31, %36 : vector<6x6x32xf32>
    %c30_i32 = arith.constant 30 : i32
    %38 = tpu.dynamic_rotate %24 by %c30_i32 dim 2 : vector<6x6x32xf32>, i32 -> vector<6x6x32xf32>
    %c30_i32_18 = arith.constant 30 : i32
    %39 = vector.broadcast %c30_i32_18 : i32 to vector<6x6x32xi32>
    %40 = arith.cmpi slt, %25, %39 : vector<6x6x32xi32>
    %cst_19 = arith.constant 0.000000e+00 : f32
    %41 = vector.broadcast %cst_19 : f32 to vector<6x6x32xf32>
    %42 = arith.select %40, %38, %41 : vector<6x6x32xi1>, vector<6x6x32xf32>
    %43 = arith.addf %37, %42 : vector<6x6x32xf32>
    %c2_i32 = arith.constant 2 : i32
    %44 = tpu.dynamic_rotate %24 by %c2_i32 dim 2 : vector<6x6x32xf32>, i32 -> vector<6x6x32xf32>
    %c2_i32_20 = arith.constant 2 : i32
    %45 = vector.broadcast %c2_i32_20 : i32 to vector<6x6x32xi32>
    %46 = arith.cmpi sge, %25, %45 : vector<6x6x32xi32>
    %cst_21 = arith.constant 0.000000e+00 : f32
    %47 = vector.broadcast %cst_21 : f32 to vector<6x6x32xf32>
    %48 = arith.select %46, %44, %47 : vector<6x6x32xi1>, vector<6x6x32xf32>
    %49 = arith.addf %43, %48 : vector<6x6x32xf32>
    %cst_22 = arith.constant 2.000000e-05 : f32
    %50 = vector.broadcast %cst_22 : f32 to vector<6x6x32xf32>
    %51 = arith.mulf %50, %49 : vector<6x6x32xf32>
    %cst_23 = arith.constant 1.000000e+00 : f32
    %52 = vector.broadcast %cst_23 : f32 to vector<6x6x32xf32>
    %53 = arith.addf %52, %51 : vector<6x6x32xf32>
    %54 = math.log %53 : vector<6x6x32xf32>
    %cst_24 = arith.constant -7.500000e-01 : f32
    %55 = vector.broadcast %cst_24 : f32 to vector<6x6x32xf32>
    %56 = arith.mulf %55, %54 : vector<6x6x32xf32>
    %57 = math.exp %56 : vector<6x6x32xf32>
    %58 = arith.mulf %23, %57 : vector<6x6x32xf32>
    %c0_25 = arith.constant 0 : index
    %c0_26 = arith.constant 0 : index
    %c0_27 = arith.constant 0 : index
    %c0_28 = arith.constant 0 : index
    %59 = vector.load %arg5[%c0_25, %c0_26, %c0_27, %c0_28] : memref<1x6x6x32xf32, #tpu.memory_space<vmem>>, vector<1x6x6x32xf32>
    %60 = vector.shape_cast %59 : vector<1x6x6x32xf32> to vector<6x6x32xf32>
    %61 = vector.shape_cast %58 : vector<6x6x32xf32> to vector<1x6x6x32xf32>
    tpu.vector_store %arg5[%c0_25, %c0_26, %c0_27, %c0_28], %61 {strides = array<i32>} : memref<1x6x6x32xf32, #tpu.memory_space<vmem>>, vector<1x6x6x32xf32>,
    return
  }
  func.func @transform_0(%arg0: i32) -> (i32, i32, i32, i32) {
    %c0_i32 = arith.constant 0 : i32
    %c0_i32_0 = arith.constant 0 : i32
    %c0_i32_1 = arith.constant 0 : i32
    %c0_i32_2 = arith.constant 0 : i32
    return %arg0, %c0_i32, %c0_i32_0, %c0_i32_1 : i32, i32, i32, i32
  }
  func.func @transform_1(%arg0: i32) -> (i32, i32, i32, i32) {
    %c0_i32 = arith.constant 0 : i32
    %c0_i32_0 = arith.constant 0 : i32
    %c0_i32_1 = arith.constant 0 : i32
    %c0_i32_2 = arith.constant 0 : i32
    return %arg0, %c0_i32, %c0_i32_0, %c0_i32_1 : i32, i32, i32, i32
  }
  func.func @transform_2(%arg0: i32) -> (i32, i32, i32, i32) {
    %c0_i32 = arith.constant 0 : i32
    %c0_i32_0 = arith.constant 0 : i32
    %c0_i32_1 = arith.constant 0 : i32
    %c0_i32_2 = arith.constant 0 : i32
    return %arg0, %c0_i32, %c0_i32_0, %c0_i32_1 : i32, i32, i32, i32
  }
  func.func @transform_3(%arg0: i32) -> (i32, i32, i32, i32) {
    %c0_i32 = arith.constant 0 : i32
    %c0_i32_0 = arith.constant 0 : i32
    %c0_i32_1 = arith.constant 0 : i32
    %c0_i32_2 = arith.constant 0 : i32
    return %arg0, %c0_i32, %c0_i32_0, %c0_i32_1 : i32, i32, i32, i32
  }
  func.func @transform_4(%arg0: i32) -> (i32, i32, i32, i32) {
    %c0_i32 = arith.constant 0 : i32
    %c0_i32_0 = arith.constant 0 : i32
    %c0_i32_1 = arith.constant 0 : i32
    %c0_i32_2 = arith.constant 0 : i32
    return %arg0, %c0_i32, %c0_i32_0, %c0_i32_1 : i32, i32, i32, i32
  }
}

module attributes {stable_mosaic.version = 11 : i64} {
  func.func @_gemm_bias_relu_kernel(%arg0: i32, %arg1: i32, %arg2: i32, %arg3: memref<1x72x128xbf16, #tpu.memory_space<vmem>>, %arg4: memref<1x128x32xbf16, #tpu.memory_space<vmem>>, %arg5: memref<1x1x32xf32, #tpu.memory_space<vmem>>, %arg6: memref<1x72x32xf32, #tpu.memory_space<vmem>>, %arg7: memref<72x32xf32, #tpu.memory_space<vmem>>) attributes {dimension_semantics = [#tpu.dimension_semantics<parallel>, #tpu.dimension_semantics<parallel>, #tpu.dimension_semantics<arbitrary>], iteration_bounds = array<i64: 2, 1, 4>, scalar_prefetch = 0 : i64, scratch_operands = 1 : i64, tpu.core_type = #tpu.core_type<tc>, window_params = [{transform_indices = @transform_0, window_bounds = array<i64: 1, 72, 128>}, {transform_indices = @transform_1, window_bounds = array<i64: 1, 128, 32>}, {transform_indices = @transform_2, window_bounds = array<i64: 1, 1, 32>}, {transform_indices = @transform_3, window_bounds = array<i64: 1, 72, 32>}]} {
    %c0_i32 = arith.constant 0 : i32
    %0 = arith.cmpi eq, %arg2, %c0_i32 : i32
    %1 = arith.extui %0 : i1 to i32
    %c0_i32_0 = arith.constant 0 : i32
    %2 = arith.cmpi ne, %1, %c0_i32_0 : i32
    scf.if %2 {
      %cst_11 = arith.constant 0.000000e+00 : f32
      %14 = vector.broadcast %cst_11 : f32 to vector<72x32xf32>
      %c0_12 = arith.constant 0 : index
      %c0_13 = arith.constant 0 : index
      %15 = vector.load %arg7[%c0_12, %c0_13] : memref<72x32xf32, #tpu.memory_space<vmem>>, vector<72x32xf32>
      tpu.vector_store %arg7[%c0_12, %c0_13], %14 {strides = array<i32>} : memref<72x32xf32, #tpu.memory_space<vmem>>, vector<72x32xf32>,
    } else {
    }
    %c0 = arith.constant 0 : index
    %c0_1 = arith.constant 0 : index
    %3 = vector.load %arg7[%c0, %c0_1] : memref<72x32xf32, #tpu.memory_space<vmem>>, vector<72x32xf32>
    %c0_2 = arith.constant 0 : index
    %c0_3 = arith.constant 0 : index
    %c0_4 = arith.constant 0 : index
    %4 = vector.load %arg3[%c0_2, %c0_3, %c0_4] : memref<1x72x128xbf16, #tpu.memory_space<vmem>>, vector<1x72x128xbf16>
    %5 = vector.shape_cast %4 : vector<1x72x128xbf16> to vector<72x128xbf16>
    %c0_5 = arith.constant 0 : index
    %c0_6 = arith.constant 0 : index
    %c0_7 = arith.constant 0 : index
    %6 = vector.load %arg4[%c0_5, %c0_6, %c0_7] : memref<1x128x32xbf16, #tpu.memory_space<vmem>>, vector<1x128x32xbf16>
    %7 = vector.shape_cast %6 : vector<1x128x32xbf16> to vector<128x32xbf16>
    %cst = arith.constant dense<0.000000e+00> : vector<72x32xf32>
    %8 = tpu.matmul %5, %7, %cst {dimension_numbers = #tpu.dot_dimension_numbers<[1], [0], [0], [1], [0, 0, 1, 1], [], []>} : vector<72x128xbf16>, vector<128x32xbf16>, vector<72x32xf32> -> vector<72x32xf32>
    %9 = arith.addf %3, %8 : vector<72x32xf32>
    %c0_8 = arith.constant 0 : index
    %c0_9 = arith.constant 0 : index
    %10 = vector.load %arg7[%c0_8, %c0_9] : memref<72x32xf32, #tpu.memory_space<vmem>>, vector<72x32xf32>
    tpu.vector_store %arg7[%c0_8, %c0_9], %9 {strides = array<i32>} : memref<72x32xf32, #tpu.memory_space<vmem>>, vector<72x32xf32>,
    %c3_i32 = arith.constant 3 : i32
    %11 = arith.cmpi eq, %arg2, %c3_i32 : i32
    %12 = arith.extui %11 : i1 to i32
    %c0_i32_10 = arith.constant 0 : i32
    %13 = arith.cmpi ne, %12, %c0_i32_10 : i32
    scf.if %13 {
      %c0_11 = arith.constant 0 : index
      %c0_12 = arith.constant 0 : index
      %14 = vector.load %arg7[%c0_11, %c0_12] : memref<72x32xf32, #tpu.memory_space<vmem>>, vector<72x32xf32>
      %c0_13 = arith.constant 0 : index
      %c0_14 = arith.constant 0 : index
      %c0_15 = arith.constant 0 : index
      %15 = vector.load %arg5[%c0_13, %c0_14, %c0_15] : memref<1x1x32xf32, #tpu.memory_space<vmem>>, vector<1x1x32xf32>
      %16 = vector.shape_cast %15 : vector<1x1x32xf32> to vector<1x32xf32>
      %17 = vector.broadcast %16 : vector<1x32xf32> to vector<72x32xf32>
      %18 = arith.addf %14, %17 : vector<72x32xf32>
      %cst_16 = arith.constant 0.000000e+00 : f32
      %19 = vector.broadcast %cst_16 : f32 to vector<72x32xf32>
      %20 = arith.maximumf %18, %19 : vector<72x32xf32>
      %c0_17 = arith.constant 0 : index
      %c0_18 = arith.constant 0 : index
      %c0_19 = arith.constant 0 : index
      %21 = vector.load %arg6[%c0_17, %c0_18, %c0_19] : memref<1x72x32xf32, #tpu.memory_space<vmem>>, vector<1x72x32xf32>
      %22 = vector.shape_cast %21 : vector<1x72x32xf32> to vector<72x32xf32>
      %23 = vector.shape_cast %20 : vector<72x32xf32> to vector<1x72x32xf32>
      tpu.vector_store %arg6[%c0_17, %c0_18, %c0_19], %23 {strides = array<i32>} : memref<1x72x32xf32, #tpu.memory_space<vmem>>, vector<1x72x32xf32>,
    } else {
    }
    return
  }
  func.func @transform_0(%arg0: i32, %arg1: i32, %arg2: i32) -> (i32, i32, i32) {
    %c0_i32 = arith.constant 0 : i32
    return %arg0, %arg1, %arg2 : i32, i32, i32
  }
  func.func @transform_1(%arg0: i32, %arg1: i32, %arg2: i32) -> (i32, i32, i32) {
    %c0_i32 = arith.constant 0 : i32
    %c0_i32_0 = arith.constant 0 : i32
    return %arg0, %arg2, %c0_i32 : i32, i32, i32
  }
  func.func @transform_2(%arg0: i32, %arg1: i32, %arg2: i32) -> (i32, i32, i32) {
    %c0_i32 = arith.constant 0 : i32
    %c0_i32_0 = arith.constant 0 : i32
    %c0_i32_1 = arith.constant 0 : i32
    return %arg0, %c0_i32, %c0_i32_0 : i32, i32, i32
  }
  func.func @transform_3(%arg0: i32, %arg1: i32, %arg2: i32) -> (i32, i32, i32) {
    %c0_i32 = arith.constant 0 : i32
    %c0_i32_0 = arith.constant 0 : i32
    return %arg0, %arg1, %c0_i32 : i32, i32, i32
  }
}

module attributes {stable_mosaic.version = 11 : i64} {
  func.func @_pool_lrn_kernel(%arg0: i32, %arg1: memref<1x3x3x64xf32, #tpu.memory_space<vmem>>, %arg2: memref<1x3x2x64xf32, #tpu.memory_space<vmem>>, %arg3: memref<1x2x3x64xf32, #tpu.memory_space<vmem>>, %arg4: memref<1x2x2x64xf32, #tpu.memory_space<vmem>>, %arg5: memref<1x2x2x64xf32, #tpu.memory_space<vmem>>) attributes {dimension_semantics = [#tpu.dimension_semantics<parallel>], iteration_bounds = array<i64: 2>, scalar_prefetch = 0 : i64, scratch_operands = 0 : i64, tpu.core_type = #tpu.core_type<tc>, window_params = [{transform_indices = @transform_0, window_bounds = array<i64: 1, 3, 3, 64>}, {transform_indices = @transform_1, window_bounds = array<i64: 1, 3, 2, 64>}, {transform_indices = @transform_2, window_bounds = array<i64: 1, 2, 3, 64>}, {transform_indices = @transform_3, window_bounds = array<i64: 1, 2, 2, 64>}, {transform_indices = @transform_4, window_bounds = array<i64: 1, 2, 2, 64>}]} {
    %c0 = arith.constant 0 : index
    %c0_0 = arith.constant 0 : index
    %c0_1 = arith.constant 0 : index
    %c0_2 = arith.constant 0 : index
    %0 = vector.load %arg1[%c0, %c0_0, %c0_1, %c0_2] : memref<1x3x3x64xf32, #tpu.memory_space<vmem>>, vector<1x3x3x64xf32>
    %1 = vector.shape_cast %0 : vector<1x3x3x64xf32> to vector<3x3x64xf32>
    %c0_3 = arith.constant 0 : index
    %c0_4 = arith.constant 0 : index
    %c0_5 = arith.constant 0 : index
    %c0_6 = arith.constant 0 : index
    %2 = vector.load %arg2[%c0_3, %c0_4, %c0_5, %c0_6] : memref<1x3x2x64xf32, #tpu.memory_space<vmem>>, vector<1x3x2x64xf32>
    %3 = vector.shape_cast %2 : vector<1x3x2x64xf32> to vector<3x2x64xf32>
    %c0_7 = arith.constant 0 : index
    %c0_8 = arith.constant 0 : index
    %c0_9 = arith.constant 0 : index
    %c0_10 = arith.constant 0 : index
    %4 = vector.load %arg3[%c0_7, %c0_8, %c0_9, %c0_10] : memref<1x2x3x64xf32, #tpu.memory_space<vmem>>, vector<1x2x3x64xf32>
    %5 = vector.shape_cast %4 : vector<1x2x3x64xf32> to vector<2x3x64xf32>
    %c0_11 = arith.constant 0 : index
    %c0_12 = arith.constant 0 : index
    %c0_13 = arith.constant 0 : index
    %c0_14 = arith.constant 0 : index
    %6 = vector.load %arg4[%c0_11, %c0_12, %c0_13, %c0_14] : memref<1x2x2x64xf32, #tpu.memory_space<vmem>>, vector<1x2x2x64xf32>
    %7 = vector.shape_cast %6 : vector<1x2x2x64xf32> to vector<2x2x64xf32>
    %8 = vector.extract_strided_slice %1 {offsets = [0, 0, 0], sizes = [2, 2, 64], strides = [1, 1, 1]} : vector<3x3x64xf32> to vector<2x2x64xf32>
    %9 = arith.maximumf %7, %8 : vector<2x2x64xf32>
    %10 = vector.extract_strided_slice %1 {offsets = [0, 1, 0], sizes = [2, 2, 64], strides = [1, 1, 1]} : vector<3x3x64xf32> to vector<2x2x64xf32>
    %11 = arith.maximumf %9, %10 : vector<2x2x64xf32>
    %12 = vector.extract_strided_slice %1 {offsets = [1, 0, 0], sizes = [2, 2, 64], strides = [1, 1, 1]} : vector<3x3x64xf32> to vector<2x2x64xf32>
    %13 = arith.maximumf %11, %12 : vector<2x2x64xf32>
    %14 = vector.extract_strided_slice %1 {offsets = [1, 1, 0], sizes = [2, 2, 64], strides = [1, 1, 1]} : vector<3x3x64xf32> to vector<2x2x64xf32>
    %15 = arith.maximumf %13, %14 : vector<2x2x64xf32>
    %16 = vector.extract_strided_slice %3 {offsets = [0, 0, 0], sizes = [2, 2, 64], strides = [1, 1, 1]} : vector<3x2x64xf32> to vector<2x2x64xf32>
    %17 = arith.maximumf %15, %16 : vector<2x2x64xf32>
    %18 = vector.extract_strided_slice %3 {offsets = [1, 0, 0], sizes = [2, 2, 64], strides = [1, 1, 1]} : vector<3x2x64xf32> to vector<2x2x64xf32>
    %19 = arith.maximumf %17, %18 : vector<2x2x64xf32>
    %20 = vector.extract_strided_slice %5 {offsets = [0, 0, 0], sizes = [2, 2, 64], strides = [1, 1, 1]} : vector<2x3x64xf32> to vector<2x2x64xf32>
    %21 = arith.maximumf %19, %20 : vector<2x2x64xf32>
    %22 = vector.extract_strided_slice %5 {offsets = [0, 1, 0], sizes = [2, 2, 64], strides = [1, 1, 1]} : vector<2x3x64xf32> to vector<2x2x64xf32>
    %23 = arith.maximumf %21, %22 : vector<2x2x64xf32>
    %24 = arith.mulf %23, %23 : vector<2x2x64xf32>
    %25 = tpu.iota {dimensions = array<i32: 2>} : vector<2x2x64xi32>
    %c63_i32 = arith.constant 63 : i32
    %26 = tpu.dynamic_rotate %24 by %c63_i32 dim 2 : vector<2x2x64xf32>, i32 -> vector<2x2x64xf32>
    %c63_i32_15 = arith.constant 63 : i32
    %27 = vector.broadcast %c63_i32_15 : i32 to vector<2x2x64xi32>
    %28 = arith.cmpi slt, %25, %27 : vector<2x2x64xi32>
    %cst = arith.constant 0.000000e+00 : f32
    %29 = vector.broadcast %cst : f32 to vector<2x2x64xf32>
    %30 = arith.select %28, %26, %29 : vector<2x2x64xi1>, vector<2x2x64xf32>
    %31 = arith.addf %24, %30 : vector<2x2x64xf32>
    %c1_i32 = arith.constant 1 : i32
    %32 = tpu.dynamic_rotate %24 by %c1_i32 dim 2 : vector<2x2x64xf32>, i32 -> vector<2x2x64xf32>
    %c1_i32_16 = arith.constant 1 : i32
    %33 = vector.broadcast %c1_i32_16 : i32 to vector<2x2x64xi32>
    %34 = arith.cmpi sge, %25, %33 : vector<2x2x64xi32>
    %cst_17 = arith.constant 0.000000e+00 : f32
    %35 = vector.broadcast %cst_17 : f32 to vector<2x2x64xf32>
    %36 = arith.select %34, %32, %35 : vector<2x2x64xi1>, vector<2x2x64xf32>
    %37 = arith.addf %31, %36 : vector<2x2x64xf32>
    %c62_i32 = arith.constant 62 : i32
    %38 = tpu.dynamic_rotate %24 by %c62_i32 dim 2 : vector<2x2x64xf32>, i32 -> vector<2x2x64xf32>
    %c62_i32_18 = arith.constant 62 : i32
    %39 = vector.broadcast %c62_i32_18 : i32 to vector<2x2x64xi32>
    %40 = arith.cmpi slt, %25, %39 : vector<2x2x64xi32>
    %cst_19 = arith.constant 0.000000e+00 : f32
    %41 = vector.broadcast %cst_19 : f32 to vector<2x2x64xf32>
    %42 = arith.select %40, %38, %41 : vector<2x2x64xi1>, vector<2x2x64xf32>
    %43 = arith.addf %37, %42 : vector<2x2x64xf32>
    %c2_i32 = arith.constant 2 : i32
    %44 = tpu.dynamic_rotate %24 by %c2_i32 dim 2 : vector<2x2x64xf32>, i32 -> vector<2x2x64xf32>
    %c2_i32_20 = arith.constant 2 : i32
    %45 = vector.broadcast %c2_i32_20 : i32 to vector<2x2x64xi32>
    %46 = arith.cmpi sge, %25, %45 : vector<2x2x64xi32>
    %cst_21 = arith.constant 0.000000e+00 : f32
    %47 = vector.broadcast %cst_21 : f32 to vector<2x2x64xf32>
    %48 = arith.select %46, %44, %47 : vector<2x2x64xi1>, vector<2x2x64xf32>
    %49 = arith.addf %43, %48 : vector<2x2x64xf32>
    %cst_22 = arith.constant 2.000000e-05 : f32
    %50 = vector.broadcast %cst_22 : f32 to vector<2x2x64xf32>
    %51 = arith.mulf %50, %49 : vector<2x2x64xf32>
    %cst_23 = arith.constant 1.000000e+00 : f32
    %52 = vector.broadcast %cst_23 : f32 to vector<2x2x64xf32>
    %53 = arith.addf %52, %51 : vector<2x2x64xf32>
    %54 = math.log %53 : vector<2x2x64xf32>
    %cst_24 = arith.constant -7.500000e-01 : f32
    %55 = vector.broadcast %cst_24 : f32 to vector<2x2x64xf32>
    %56 = arith.mulf %55, %54 : vector<2x2x64xf32>
    %57 = math.exp %56 : vector<2x2x64xf32>
    %58 = arith.mulf %23, %57 : vector<2x2x64xf32>
    %c0_25 = arith.constant 0 : index
    %c0_26 = arith.constant 0 : index
    %c0_27 = arith.constant 0 : index
    %c0_28 = arith.constant 0 : index
    %59 = vector.load %arg5[%c0_25, %c0_26, %c0_27, %c0_28] : memref<1x2x2x64xf32, #tpu.memory_space<vmem>>, vector<1x2x2x64xf32>
    %60 = vector.shape_cast %59 : vector<1x2x2x64xf32> to vector<2x2x64xf32>
    %61 = vector.shape_cast %58 : vector<2x2x64xf32> to vector<1x2x2x64xf32>
    tpu.vector_store %arg5[%c0_25, %c0_26, %c0_27, %c0_28], %61 {strides = array<i32>} : memref<1x2x2x64xf32, #tpu.memory_space<vmem>>, vector<1x2x2x64xf32>,
    return
  }
  func.func @transform_0(%arg0: i32) -> (i32, i32, i32, i32) {
    %c0_i32 = arith.constant 0 : i32
    %c0_i32_0 = arith.constant 0 : i32
    %c0_i32_1 = arith.constant 0 : i32
    %c0_i32_2 = arith.constant 0 : i32
    return %arg0, %c0_i32, %c0_i32_0, %c0_i32_1 : i32, i32, i32, i32
  }
  func.func @transform_1(%arg0: i32) -> (i32, i32, i32, i32) {
    %c0_i32 = arith.constant 0 : i32
    %c0_i32_0 = arith.constant 0 : i32
    %c0_i32_1 = arith.constant 0 : i32
    %c0_i32_2 = arith.constant 0 : i32
    return %arg0, %c0_i32, %c0_i32_0, %c0_i32_1 : i32, i32, i32, i32
  }
  func.func @transform_2(%arg0: i32) -> (i32, i32, i32, i32) {
    %c0_i32 = arith.constant 0 : i32
    %c0_i32_0 = arith.constant 0 : i32
    %c0_i32_1 = arith.constant 0 : i32
    %c0_i32_2 = arith.constant 0 : i32
    return %arg0, %c0_i32, %c0_i32_0, %c0_i32_1 : i32, i32, i32, i32
  }
  func.func @transform_3(%arg0: i32) -> (i32, i32, i32, i32) {
    %c0_i32 = arith.constant 0 : i32
    %c0_i32_0 = arith.constant 0 : i32
    %c0_i32_1 = arith.constant 0 : i32
    %c0_i32_2 = arith.constant 0 : i32
    return %arg0, %c0_i32, %c0_i32_0, %c0_i32_1 : i32, i32, i32, i32
  }
  func.func @transform_4(%arg0: i32) -> (i32, i32, i32, i32) {
    %c0_i32 = arith.constant 0 : i32
    %c0_i32_0 = arith.constant 0 : i32
    %c0_i32_1 = arith.constant 0 : i32
    %c0_i32_2 = arith.constant 0 : i32
    return %arg0, %c0_i32, %c0_i32_0, %c0_i32_1 : i32, i32, i32, i32
  }
}

module attributes {stable_mosaic.version = 11 : i64} {
  func.func @_gemm_bias_relu_1x1_kernel(%arg0: i32, %arg1: i32, %arg2: i32, %arg3: memref<1x8x128xbf16, #tpu.memory_space<vmem>>, %arg4: memref<1x128x32xbf16, #tpu.memory_space<vmem>>, %arg5: memref<1x1x32xf32, #tpu.memory_space<vmem>>, %arg6: memref<32x16xf32, #tpu.memory_space<vmem>>, %arg7: memref<1x16xf32, #tpu.memory_space<vmem>>, %arg8: memref<1x8x16xf32, #tpu.memory_space<vmem>>, %arg9: memref<8x32xf32, #tpu.memory_space<vmem>>) attributes {dimension_semantics = [#tpu.dimension_semantics<parallel>, #tpu.dimension_semantics<parallel>, #tpu.dimension_semantics<arbitrary>], iteration_bounds = array<i64: 1, 1, 5>, scalar_prefetch = 0 : i64, scratch_operands = 1 : i64, tpu.core_type = #tpu.core_type<tc>, window_params = [{transform_indices = @transform_0, window_bounds = array<i64: 1, 8, 128>}, {transform_indices = @transform_1, window_bounds = array<i64: 1, 128, 32>}, {transform_indices = @transform_2, window_bounds = array<i64: 1, 1, 32>}, {pipeline_mode = #tpu.pipeline_mode<synchronous>, transform_indices = @transform_3, window_bounds = array<i64: 32, 16>}, {pipeline_mode = #tpu.pipeline_mode<synchronous>, transform_indices = @transform_4, window_bounds = array<i64: 1, 16>}, {transform_indices = @transform_5, window_bounds = array<i64: 1, 8, 16>}]} {
    %c0_i32 = arith.constant 0 : i32
    %0 = arith.cmpi eq, %arg2, %c0_i32 : i32
    %1 = arith.extui %0 : i1 to i32
    %c0_i32_0 = arith.constant 0 : i32
    %2 = arith.cmpi ne, %1, %c0_i32_0 : i32
    scf.if %2 {
      %cst_11 = arith.constant 0.000000e+00 : f32
      %14 = vector.broadcast %cst_11 : f32 to vector<8x32xf32>
      %c0_12 = arith.constant 0 : index
      %c0_13 = arith.constant 0 : index
      %15 = vector.load %arg9[%c0_12, %c0_13] : memref<8x32xf32, #tpu.memory_space<vmem>>, vector<8x32xf32>
      tpu.vector_store %arg9[%c0_12, %c0_13], %14 {strides = array<i32>} : memref<8x32xf32, #tpu.memory_space<vmem>>, vector<8x32xf32>,
    } else {
    }
    %c0 = arith.constant 0 : index
    %c0_1 = arith.constant 0 : index
    %3 = vector.load %arg9[%c0, %c0_1] : memref<8x32xf32, #tpu.memory_space<vmem>>, vector<8x32xf32>
    %c0_2 = arith.constant 0 : index
    %c0_3 = arith.constant 0 : index
    %c0_4 = arith.constant 0 : index
    %4 = vector.load %arg3[%c0_2, %c0_3, %c0_4] : memref<1x8x128xbf16, #tpu.memory_space<vmem>>, vector<1x8x128xbf16>
    %5 = vector.shape_cast %4 : vector<1x8x128xbf16> to vector<8x128xbf16>
    %c0_5 = arith.constant 0 : index
    %c0_6 = arith.constant 0 : index
    %c0_7 = arith.constant 0 : index
    %6 = vector.load %arg4[%c0_5, %c0_6, %c0_7] : memref<1x128x32xbf16, #tpu.memory_space<vmem>>, vector<1x128x32xbf16>
    %7 = vector.shape_cast %6 : vector<1x128x32xbf16> to vector<128x32xbf16>
    %cst = arith.constant dense<0.000000e+00> : vector<8x32xf32>
    %8 = tpu.matmul %5, %7, %cst {dimension_numbers = #tpu.dot_dimension_numbers<[1], [0], [0], [1], [0, 0, 1, 1], [], []>} : vector<8x128xbf16>, vector<128x32xbf16>, vector<8x32xf32> -> vector<8x32xf32>
    %9 = arith.addf %3, %8 : vector<8x32xf32>
    %c0_8 = arith.constant 0 : index
    %c0_9 = arith.constant 0 : index
    %10 = vector.load %arg9[%c0_8, %c0_9] : memref<8x32xf32, #tpu.memory_space<vmem>>, vector<8x32xf32>
    tpu.vector_store %arg9[%c0_8, %c0_9], %9 {strides = array<i32>} : memref<8x32xf32, #tpu.memory_space<vmem>>, vector<8x32xf32>,
    %c4_i32 = arith.constant 4 : i32
    %11 = arith.cmpi eq, %arg2, %c4_i32 : i32
    %12 = arith.extui %11 : i1 to i32
    %c0_i32_10 = arith.constant 0 : i32
    %13 = arith.cmpi ne, %12, %c0_i32_10 : i32
    scf.if %13 {
      %c0_11 = arith.constant 0 : index
      %c0_12 = arith.constant 0 : index
      %14 = vector.load %arg9[%c0_11, %c0_12] : memref<8x32xf32, #tpu.memory_space<vmem>>, vector<8x32xf32>
      %c0_13 = arith.constant 0 : index
      %c0_14 = arith.constant 0 : index
      %c0_15 = arith.constant 0 : index
      %15 = vector.load %arg5[%c0_13, %c0_14, %c0_15] : memref<1x1x32xf32, #tpu.memory_space<vmem>>, vector<1x1x32xf32>
      %16 = vector.shape_cast %15 : vector<1x1x32xf32> to vector<1x32xf32>
      %17 = vector.broadcast %16 : vector<1x32xf32> to vector<8x32xf32>
      %18 = arith.addf %14, %17 : vector<8x32xf32>
      %cst_16 = arith.constant 0.000000e+00 : f32
      %19 = vector.broadcast %cst_16 : f32 to vector<8x32xf32>
      %20 = arith.maximumf %18, %19 : vector<8x32xf32>
      %c0_17 = arith.constant 0 : index
      %c0_18 = arith.constant 0 : index
      %21 = vector.load %arg6[%c0_17, %c0_18] : memref<32x16xf32, #tpu.memory_space<vmem>>, vector<32x16xf32>
      %cst_19 = arith.constant dense<0.000000e+00> : vector<8x16xf32>
      %22 = tpu.matmul %20, %21, %cst_19 {dimension_numbers = #tpu.dot_dimension_numbers<[1], [0], [0], [1], [0, 0, 1, 1], [], []>} : vector<8x32xf32>, vector<32x16xf32>, vector<8x16xf32> -> vector<8x16xf32>
      %c0_20 = arith.constant 0 : index
      %c0_21 = arith.constant 0 : index
      %23 = vector.load %arg7[%c0_20, %c0_21] : memref<1x16xf32, #tpu.memory_space<vmem>>, vector<1x16xf32>
      %24 = vector.broadcast %23 : vector<1x16xf32> to vector<8x16xf32>
      %25 = arith.addf %22, %24 : vector<8x16xf32>
      %cst_22 = arith.constant 0.000000e+00 : f32
      %26 = vector.broadcast %cst_22 : f32 to vector<8x16xf32>
      %27 = arith.maximumf %25, %26 : vector<8x16xf32>
      %c0_23 = arith.constant 0 : index
      %c0_24 = arith.constant 0 : index
      %c0_25 = arith.constant 0 : index
      %28 = vector.load %arg8[%c0_23, %c0_24, %c0_25] : memref<1x8x16xf32, #tpu.memory_space<vmem>>, vector<1x8x16xf32>
      %29 = vector.shape_cast %28 : vector<1x8x16xf32> to vector<8x16xf32>
      %30 = vector.shape_cast %27 : vector<8x16xf32> to vector<1x8x16xf32>
      tpu.vector_store %arg8[%c0_23, %c0_24, %c0_25], %30 {strides = array<i32>} : memref<1x8x16xf32, #tpu.memory_space<vmem>>, vector<1x8x16xf32>,
    } else {
    }
    return
  }
  func.func @transform_0(%arg0: i32, %arg1: i32, %arg2: i32) -> (i32, i32, i32) {
    %c0_i32 = arith.constant 0 : i32
    return %arg0, %arg1, %arg2 : i32, i32, i32
  }
  func.func @transform_1(%arg0: i32, %arg1: i32, %arg2: i32) -> (i32, i32, i32) {
    %c0_i32 = arith.constant 0 : i32
    %c0_i32_0 = arith.constant 0 : i32
    return %arg0, %arg2, %c0_i32 : i32, i32, i32
  }
  func.func @transform_2(%arg0: i32, %arg1: i32, %arg2: i32) -> (i32, i32, i32) {
    %c0_i32 = arith.constant 0 : i32
    %c0_i32_0 = arith.constant 0 : i32
    %c0_i32_1 = arith.constant 0 : i32
    return %arg0, %c0_i32, %c0_i32_0 : i32, i32, i32
  }
  func.func @transform_3(%arg0: i32, %arg1: i32, %arg2: i32) -> (i32, i32) {
    %c0_i32 = arith.constant 0 : i32
    %c0_i32_0 = arith.constant 0 : i32
    %c0_i32_1 = arith.constant 0 : i32
    return %c0_i32, %c0_i32_0 : i32, i32
  }
  func.func @transform_4(%arg0: i32, %arg1: i32, %arg2: i32) -> (i32, i32) {
    %c0_i32 = arith.constant 0 : i32
    %c0_i32_0 = arith.constant 0 : i32
    %c0_i32_1 = arith.constant 0 : i32
    return %c0_i32, %c0_i32_0 : i32, i32
  }
  func.func @transform_5(%arg0: i32, %arg1: i32, %arg2: i32) -> (i32, i32, i32) {
    %c0_i32 = arith.constant 0 : i32
    %c0_i32_0 = arith.constant 0 : i32
    return %arg0, %arg1, %c0_i32 : i32, i32, i32
  }
}

</mosaic_0001>

<bundles_post_ra>
// kernel: squeeze.2
= control target key start
LH: loop header
LB: loop body
LE: loop exit
PB: predicated region body
PF: predicated region fallthrough
CT: control target
= control target key end

     0   :  { %vm3_vm0 = vcmask 261120   ;;  %s841_s0 = inlined_call_operand.vmem [shape: f32[1,392,32], index: 0, kind: input, shape index: {}]   ;;  %s842_s1 = inlined_call_operand.vmem [shape: f32[2,14,14,32], index: 1, kind: output, shape index: {}]  }
   0x1   :  { %v2_v0 = vld [vmem:[%s841_s0] sm:$0xff]   ;;  %v287_v1 = vld [vmem:[%s841_s0 + $0x8] sm:$0xff]   ;;  %v290_v2 = vld [vmem:[%s841_s0 + $0x10] sm:$0xff]  }
   0x2   :  { %4 = vst.msk [vmem:[%s842_s1] sm:$0xff] %vm3_vm0, %v2_v0   ;;  %288 = vst.msk [vmem:[%s842_s1 + $0x8] sm:$0x3f] %vm3_vm0, %v287_v1   ;;  %v292_v3 = vld [vmem:[%s841_s0 + $0x18] sm:$0xff]   ;;  %v295_v4 = vld [vmem:[%s841_s0 + $0x20] sm:$0xff]  }
   0x3   :  { %289 = vst.msk [vmem:[%s842_s1 + $0xa] sm:$0xc0] %vm3_vm0, %v287_v1   ;;  %291 = vst.msk [vmem:[%s842_s1 + $0x12] sm:$0xff] %vm3_vm0, %v290_v2   ;;  %v297_v5 = vld [vmem:[%s841_s0 + $0x28] sm:$0xff]   ;;  %v300_v6 = vld [vmem:[%s841_s0 + $0x30] sm:$0xff]  }
   0x4   :  { %293 = vst.msk [vmem:[%s842_s1 + $0x1a] sm:$0xf] %vm3_vm0, %v292_v3   ;;  %294 = vst.msk [vmem:[%s842_s1 + $0x1c] sm:$0xf0] %vm3_vm0, %v292_v3   ;;  %v302_v7 = vld [vmem:[%s841_s0 + $0x38] sm:$0xff]   ;;  %v304_v8 = vld [vmem:[%s841_s0 + $0x40] sm:$0xff]  }
   0x5   :  { %296 = vst.msk [vmem:[%s842_s1 + $0x24] sm:$0xff] %vm3_vm0, %v295_v4   ;;  %298 = vst.msk [vmem:[%s842_s1 + $0x2c] sm:$0x3] %vm3_vm0, %v297_v5   ;;  %v307_v9 = vld [vmem:[%s841_s0 + $0x48] sm:$0xff]   ;;  %v309_v10 = vld [vmem:[%s841_s0 + $0x50] sm:$0xff]  }
   0x6   :  { %299 = vst.msk [vmem:[%s842_s1 + $0x2e] sm:$0xfc] %vm3_vm0, %v297_v5   ;;  %301 = vst.msk [vmem:[%s842_s1 + $0x36] sm:$0xff] %vm3_vm0, %v300_v6   ;;  %v312_v11 = vld [vmem:[%s841_s0 + $0x58] sm:$0xff]   ;;  %v314_v12 = vld [vmem:[%s841_s0 + $0x60] sm:$0xff]  }
   0x7   :  { %303 = vst.msk [vmem:[%s842_s1 + $0x40] sm:$0xff] %vm3_vm0, %v302_v7   ;;  %305 = vst.msk [vmem:[%s842_s1 + $0x48] sm:$0x3f] %vm3_vm0, %v304_v8   ;;  %v317_v13 = vld [vmem:[%s841_s0 + $0x68] sm:$0xff]   ;;  %v319_v14 = vld [vmem:[%s841_s0 + $0x70] sm:$0xff]  }
   0x8   :  { %306 = vst.msk [vmem:[%s842_s1 + $0x4a] sm:$0xc0] %vm3_vm0, %v304_v8   ;;  %308 = vst.msk [vmem:[%s842_s1 + $0x52] sm:$0xff] %vm3_vm0, %v307_v9   ;;  %v321_v15 = vld [vmem:[%s841_s0 + $0x78] sm:$0xff]   ;;  %v324_v16 = vld [vmem:[%s841_s0 + $0x80] sm:$0xff]  }
   0x9   :  { %310 = vst.msk [vmem:[%s842_s1 + $0x5a] sm:$0xf] %vm3_vm0, %v309_v10   ;;  %311 = vst.msk [vmem:[%s842_s1 + $0x5c] sm:$0xf0] %vm3_vm0, %v309_v10   ;;  %v326_v17 = vld [vmem:[%s841_s0 + $0x88] sm:$0xff]   ;;  %v329_v18 = vld [vmem:[%s841_s0 + $0x90] sm:$0xff]  }
   0xa   :  { %313 = vst.msk [vmem:[%s842_s1 + $0x64] sm:$0xff] %vm3_vm0, %v312_v11   ;;  %315 = vst.msk [vmem:[%s842_s1 + $0x6c] sm:$0x3] %vm3_vm0, %v314_v12   ;;  %v331_v19 = vld [vmem:[%s841_s0 + $0x98] sm:$0xff]   ;;  %v334_v20 = vld [vmem:[%s841_s0 + $0xa0] sm:$0xff]  }
   0xb   :  { %316 = vst.msk [vmem:[%s842_s1 + $0x6e] sm:$0xfc] %vm3_vm0, %v314_v12   ;;  %318 = vst.msk [vmem:[%s842_s1 + $0x76] sm:$0xff] %vm3_vm0, %v317_v13   ;;  %v336_v21 = vld [vmem:[%s841_s0 + $0xa8] sm:$0xff]   ;;  %v338_v22 = vld [vmem:[%s841_s0 + $0xb0] sm:$0xff]  }
   0xc   :  { %320 = vst.msk [vmem:[%s842_s1 + $0x80] sm:$0xff] %vm3_vm0, %v319_v14   ;;  %322 = vst.msk [vmem:[%s842_s1 + $0x88] sm:$0x3f] %vm3_vm0, %v321_v15   ;;  %v341_v23 = vld [vmem:[%s841_s0 + $0xb8] sm:$0xff]   ;;  %v343_v24 = vld [vmem:[%s841_s0 + $0xc0] sm:$0xff]  }
   0xd   :  { %323 = vst.msk [vmem:[%s842_s1 + $0x8a] sm:$0xc0] %vm3_vm0, %v321_v15   ;;  %325 = vst.msk [vmem:[%s842_s1 + $0x92] sm:$0xff] %vm3_vm0, %v324_v16   ;;  %v346_v25 = vld [vmem:[%s841_s0 + $0xc8] sm:$0xff]   ;;  %v348_v26 = vld [vmem:[%s841_s0 + $0xd0] sm:$0xff]  }
   0xe   :  { %327 = vst.msk [vmem:[%s842_s1 + $0x9a] sm:$0xf] %vm3_vm0, %v326_v17   ;;  %328 = vst.msk [vmem:[%s842_s1 + $0x9c] sm:$0xf0] %vm3_vm0, %v326_v17   ;;  %v351_v27 = vld [vmem:[%s841_s0 + $0xd8] sm:$0xff]   ;;  %v353_v28 = vld [vmem:[%s841_s0 + $0xe0] sm:$0xff]  }
   0xf   :  { %330 = vst.msk [vmem:[%s842_s1 + $0xa4] sm:$0xff] %vm3_vm0, %v329_v18   ;;  %332 = vst.msk [vmem:[%s842_s1 + $0xac] sm:$0x3] %vm3_vm0, %v331_v19   ;;  %v355_v29 = vld [vmem:[%s841_s0 + $0xe8] sm:$0xff]   ;;  %v358_v30 = vld [vmem:[%s841_s0 + $0xf0] sm:$0xff]  }
  0x10   :  { %333 = vst.msk [vmem:[%s842_s1 + $0xae] sm:$0xfc] %vm3_vm0, %v331_v19   ;;  %335 = vst.msk [vmem:[%s842_s1 + $0xb6] sm:$0xff] %vm3_vm0, %v334_v20   ;;  %v360_v31 = vld [vmem:[%s841_s0 + $0xf8] sm:$0xff]   ;;  %v363_v32 = vld [vmem:[%s841_s0 + $0x100] sm:$0xff]  }
  0x11   :  { %337 = vst.msk [vmem:[%s842_s1 + $0xc0] sm:$0xff] %vm3_vm0, %v336_v21   ;;  %339 = vst.msk [vmem:[%s842_s1 + $0xc8] sm:$0x3f] %vm3_vm0, %v338_v22   ;;  %v365_v33 = vld [vmem:[%s841_s0 + $0x108] sm:$0xff]   ;;  %v368_v34 = vld [vmem:[%s841_s0 + $0x110] sm:$0xff]  }
  0x12   :  { %340 = vst.msk [vmem:[%s842_s1 + $0xca] sm:$0xc0] %vm3_vm0, %v338_v22   ;;  %342 = vst.msk [vmem:[%s842_s1 + $0xd2] sm:$0xff] %vm3_vm0, %v341_v23   ;;  %v370_v35 = vld [vmem:[%s841_s0 + $0x118] sm:$0xff]   ;;  %v372_v36 = vld [vmem:[%s841_s0 + $0x120] sm:$0xff]  }
  0x13   :  { %344 = vst.msk [vmem:[%s842_s1 + $0xda] sm:$0xf] %vm3_vm0, %v343_v24   ;;  %345 = vst.msk [vmem:[%s842_s1 + $0xdc] sm:$0xf0] %vm3_vm0, %v343_v24   ;;  %v375_v37 = vld [vmem:[%s841_s0 + $0x128] sm:$0xff]   ;;  %v377_v38 = vld [vmem:[%s841_s0 + $0x130] sm:$0xff]  }
  0x14   :  { %347 = vst.msk [vmem:[%s842_s1 + $0xe4] sm:$0xff] %vm3_vm0, %v346_v25   ;;  %349 = vst.msk [vmem:[%s842_s1 + $0xec] sm:$0x3] %vm3_vm0, %v348_v26   ;;  %v380_v39 = vld [vmem:[%s841_s0 + $0x138] sm:$0xff]   ;;  %v382_v40 = vld [vmem:[%s841_s0 + $0x140] sm:$0xff]  }
  0x15   :  { %350 = vst.msk [vmem:[%s842_s1 + $0xee] sm:$0xfc] %vm3_vm0, %v348_v26   ;;  %352 = vst.msk [vmem:[%s842_s1 + $0xf6] sm:$0xff] %vm3_vm0, %v351_v27   ;;  %v385_v41 = vld [vmem:[%s841_s0 + $0x148] sm:$0xff]   ;;  %v387_v42 = vld [vmem:[%s841_s0 + $0x150] sm:$0xff]  }
  0x16   :  { %354 = vst.msk [vmem:[%s842_s1 + $0x100] sm:$0xff] %vm3_vm0, %v353_v28   ;;  %356 = vst.msk [vmem:[%s842_s1 + $0x108] sm:$0x3f] %vm3_vm0, %v355_v29   ;;  %v389_v43 = vld [vmem:[%s841_s0 + $0x158] sm:$0xff]   ;;  %v392_v44 = vld [vmem:[%s841_s0 + $0x160] sm:$0xff]  }
  0x17   :  { %357 = vst.msk [vmem:[%s842_s1 + $0x10a] sm:$0xc0] %vm3_vm0, %v355_v29   ;;  %359 = vst.msk [vmem:[%s842_s1 + $0x112] sm:$0xff] %vm3_vm0, %v358_v30   ;;  %v394_v45 = vld [vmem:[%s841_s0 + $0x168] sm:$0xff]   ;;  %v397_v46 = vld [vmem:[%s841_s0 + $0x170] sm:$0xff]  }
  0x18   :  { %361 = vst.msk [vmem:[%s842_s1 + $0x11a] sm:$0xf] %vm3_vm0, %v360_v31   ;;  %362 = vst.msk [vmem:[%s842_s1 + $0x11c] sm:$0xf0] %vm3_vm0, %v360_v31   ;;  %v399_v47 = vld [vmem:[%s841_s0 + $0x178] sm:$0xff]   ;;  %v402_v48 = vld [vmem:[%s841_s0 + $0x180] sm:$0xff]  }
  0x19   :  { %364 = vst.msk [vmem:[%s842_s1 + $0x124] sm:$0xff] %vm3_vm0, %v363_v32   ;;  %366 = vst.msk [vmem:[%s842_s1 + $0x12c] sm:$0x3] %vm3_vm0, %v365_v33  }
  0x1a   :  { %367 = vst.msk [vmem:[%s842_s1 + $0x12e] sm:$0xfc] %vm3_vm0, %v365_v33   ;;  %369 = vst.msk [vmem:[%s842_s1 + $0x136] sm:$0xff] %vm3_vm0, %v368_v34  }
  0x1b   :  { %371 = vst.msk [vmem:[%s842_s1 + $0x140] sm:$0xff] %vm3_vm0, %v370_v35   ;;  %373 = vst.msk [vmem:[%s842_s1 + $0x148] sm:$0x3f] %vm3_vm0, %v372_v36  }
  0x1c   :  { %374 = vst.msk [vmem:[%s842_s1 + $0x14a] sm:$0xc0] %vm3_vm0, %v372_v36   ;;  %376 = vst.msk [vmem:[%s842_s1 + $0x152] sm:$0xff] %vm3_vm0, %v375_v37  }
  0x1d   :  { %378 = vst.msk [vmem:[%s842_s1 + $0x15a] sm:$0xf] %vm3_vm0, %v377_v38   ;;  %379 = vst.msk [vmem:[%s842_s1 + $0x15c] sm:$0xf0] %vm3_vm0, %v377_v38  }
  0x1e   :  { %381 = vst.msk [vmem:[%s842_s1 + $0x164] sm:$0xff] %vm3_vm0, %v380_v39   ;;  %383 = vst.msk [vmem:[%s842_s1 + $0x16c] sm:$0x3] %vm3_vm0, %v382_v40  }
  0x1f   :  { %384 = vst.msk [vmem:[%s842_s1 + $0x16e] sm:$0xfc] %vm3_vm0, %v382_v40   ;;  %386 = vst.msk [vmem:[%s842_s1 + $0x176] sm:$0xff] %vm3_vm0, %v385_v41  }
  0x20   :  { %388 = vst.msk [vmem:[%s842_s1 + $0x180] sm:$0xff] %vm3_vm0, %v387_v42   ;;  %390 = vst.msk [vmem:[%s842_s1 + $0x188] sm:$0x3f] %vm3_vm0, %v389_v43  }
  0x21   :  { %391 = vst.msk [vmem:[%s842_s1 + $0x18a] sm:$0xc0] %vm3_vm0, %v389_v43   ;;  %393 = vst.msk [vmem:[%s842_s1 + $0x192] sm:$0xff] %vm3_vm0, %v392_v44  }
  0x22   :  { %395 = vst.msk [vmem:[%s842_s1 + $0x19a] sm:$0xf] %vm3_vm0, %v394_v45   ;;  %396 = vst.msk [vmem:[%s842_s1 + $0x19c] sm:$0xf0] %vm3_vm0, %v394_v45  }
  0x23   :  { %398 = vst.msk [vmem:[%s842_s1 + $0x1a4] sm:$0xff] %vm3_vm0, %v397_v46   ;;  %400 = vst.msk [vmem:[%s842_s1 + $0x1ac] sm:$0x3] %vm3_vm0, %v399_v47  }
  0x24   :  { %401 = vst.msk [vmem:[%s842_s1 + $0x1ae] sm:$0xfc] %vm3_vm0, %v399_v47   ;;  %403 = vst.msk [vmem:[%s842_s1 + $0x1b6] sm:$0xff] %vm3_vm0, %v402_v48  }

// kernel: _lambda_.6
= control target key start
LH: loop header
LB: loop body
LE: loop exit
PB: predicated region body
PF: predicated region fallthrough
CT: control target
= control target key end

     0   :  { %s781_s15 = smov 0   ;;  %s996_s0 = inlined_call_operand.vmem [shape: f32[2,7,7,32], index: 0, kind: input, shape index: {}]   ;;  %s997_s1 = inlined_call_operand.vmem [shape: f32[2,7,6,32], index: 1, kind: input, shape index: {}]   ;;  %s998_s2 = inlined_call_operand.vmem [shape: f32[2,6,7,32], index: 2, kind: input, shape index: {}]   ;;  %s999_s3 = inlined_call_operand.vmem [shape: f32[2,6,6,32], index: 3, kind: input, shape index: {}]   ;;  %s1000_s4 = inlined_call_operand.vmem [shape: f32[2,6,6,32], index: 4, kind: output, shape index: {}]  }
   0x1 LB: > { %s692_s16 = sadd.s32 4294967295, %s749_s15   ;;  %p696_p0 = scmp.ge.s32.totalorder %s749_s15, 1  ;;  %s749_s15 = sphi %s781_s15, %s14_s15  }
   0x2   : > { %p192_p1 = scmp.lt.s32.totalorder %s749_s15, 3 }
   0x4   : > { %p193_p2 = pnand %p696_p0, %p192_p1 }
   0x5   : > { %p233_p3 = scmp.lt.s32.totalorder (!%p193_p2), %s692_s16, 1  ;;  %s751_s5 = smov (!%p193_p2), 32   ;;  %vm379_vm0 = vcmask (!%p193_p2), 1047808   ;;  %vm594_vm5 = vcmask (!%p193_p2), 259072  }
   0x6   : > { %196 = sbr.rel (%p193_p2) target bundleno = 470 (0x1d6), region = 36  ;;  %s752_s6 = smov (!%p193_p2), 127  }
   0x7   : > { %s753_s7 = smov (!%p193_p2), 97   ;;  %s754_s8 = smov (!%p193_p2), 126  }
   0x8   : > { %s755_s9 = smov (!%p193_p2), 98  }
   0xd   : > { %s1002_s16 = smov (!%p233_p3, %s692_s16), 1 }
   0xe   : > { %s704_s17 = smul.u32 56, %s1002_s16 }
   0xf   : > { %s789_s18 = smul.u32 48, %s1002_s16 }
  0x10   : > { %s794_s21 = scalar_lea.vmem %s996_s0, %s704_s17  ;;  %s810_s27 = scalar_lea.vmem %s997_s1, %s704_s17 }
  0x11   : > { %s800_s24 = scalar_lea.vmem %s999_s3, %s789_s18  ;;  %v258_v0 = vld [vmem:[%s794_s21] sm:$0x7f]  ;;  %v259_v1 = vld [vmem:[%s794_s21 + $0x8] sm:$0x7f]  ;;  %v260_v5 = vld [vmem:[%s794_s21 + $0x10] sm:$0x7f]  ;;  %s817_s30 = scalar_lea.vmem %s998_s2, %s789_s18 }
  0x12   : > { %v278_v2 = vld [vmem:[%s800_s24] sm:$0x3f]  ;;  %v296_v4 = vrot.slane %v258_v0, 1  ;;  %v261_v6 = vld [vmem:[%s794_s21 + $0x18] sm:$0x7f]  ;;  %v297_v7 = vrot.slane %v259_v1, 1  ;;  %s257_s12 = scalar_lea.vmem %s1000_s4, %s789_s18 }
  0x13   : > { %v284_v3 = vmax.f32 %v278_v2, %v258_v0  ;;  %v280_v9 = vld [vmem:[%s800_s24 + $0x10] sm:$0x3f]  ;;  %v298_v10 = vrot.slane %v260_v5, 1  ;;  %v279_v12 = vld [vmem:[%s800_s24 + $0x8] sm:$0x3f]  ;;  %v299_v14 = vrot.slane %v261_v6, 1 }
  0x14   : > { %v286_v11 = vmax.f32 %v280_v9, %v260_v5  ;;  %v285_v15 = vmax.f32 %v279_v12, %v259_v1  ;;  %v262_v16 = vld [vmem:[%s794_s21 + $0x20] sm:$0x7f]  ;;  %v281_v19 = vld [vmem:[%s800_s24 + $0x18] sm:$0x3f]  ;;  %v263_v25 = vld [vmem:[%s794_s21 + $0x28] sm:$0x7f] }
  0x15   : > { %v308_v8 = vmax.f32 %v284_v3, %v296_v4  ;;  %v265_v17 = vld [vmem:[%s810_s27] sm:$0x3f]  ;;  %v287_v23 = vmax.f32 %v281_v19, %v261_v6  ;;  %v300_v24 = vrot.slane %v262_v16, 1  ;;  %v266_v26 = vld [vmem:[%s810_s27 + $0x8] sm:$0x3f]  ;;  %v301_v37 = vrot.slane %v263_v25, 1 }
  0x16   : > { %v310_v18 = vmax.f32 %v286_v11, %v298_v10  ;;  %v272_v20 = vld [vmem:[%s817_s30] sm:$0x7f]  ;;  %v309_v22 = vmax.f32 %v285_v15, %v297_v7  ;;  %v267_v30 = vld [vmem:[%s810_s27 + $0x10] sm:$0x3f]  ;;  %v283_v38 = vld [vmem:[%s800_s24 + $0x28] sm:$0x3f] }
  0x17   : > { %v314_v13 = vmax.f32 %v308_v8, %v259_v1  ;;  %v282_v28 = vld [vmem:[%s800_s24 + $0x20] sm:$0x3f]  ;;  %v274_v31 = vld [vmem:[%s817_s30 + $0x10] sm:$0x7f]  ;;  %v311_v33 = vmax.f32 %v287_v23, %v299_v14  ;;  %v353_v35 = vrot.slane %v272_v20, 1  ;;  %v289_v48 = vmax.f32 %v283_v38, %v263_v25 }
  0x18   : > { %v316_v27 = vmax.f32 %v310_v18, %v261_v6  ;;  %v315_v32 = vmax.f32 %v309_v22, %v260_v5  ;;  %v288_v34 = vmax.f32 %v282_v28, %v262_v16  ;;  %v268_v40 = vld [vmem:[%s810_s27 + $0x18] sm:$0x3f]  ;;  %v273_v41 = vld [vmem:[%s817_s30 + $0x8] sm:$0x7f]  ;;  %v264_v45 = vld [vmem:[%s794_s21 + $0x30] sm:$0x7f] }
  0x19   : > { %v323_v21 = vmax.f32 %v314_v13, %v297_v7  ;;  %v317_v43 = vmax.f32 %v311_v33, %v262_v16  ;;  %v355_v47 = vrot.slane %v274_v31, 1  ;;  %v275_v51 = vld [vmem:[%s817_s30 + $0x18] sm:$0x7f]  ;;  %v354_v55 = vrot.slane %v273_v41, 1  ;;  %v269_v56 = vld [vmem:[%s810_s27 + $0x20] sm:$0x3f] }
  0x1a   : > { %v325_v36 = vmax.f32 %v316_v27, %v299_v14  ;;  %v324_v42 = vmax.f32 %v315_v32, %v298_v10  ;;  %v312_v44 = vmax.f32 %v288_v34, %v300_v24  ;;  %v313_v57 = vmax.f32 %v289_v48, %v301_v37  ;;  %v270_v1 = vld [vmem:[%s810_s27 + $0x28] sm:$0x3f]  ;;  %v276_v2 = vld [vmem:[%s817_s30 + $0x20] sm:$0x7f]  ;;  %v271_v14 = vld [vmem:[%s810_s27 + $0x30] sm:$0x3f] }
  0x1b   : > { %v329_v29 = vmax.f32 %v323_v21, %v265_v17  ;;  %v326_v52 = vmax.f32 %v317_v43, %v300_v24  ;;  %v321_v58 = vrot.slane %v264_v45, 1  ;;  %v356_v0 = vrot.slane %v275_v51, 1  ;;  %v277_v15 = vld [vmem:[%s817_s30 + $0x28] sm:$0x7f] }
  0x1c   : > { %v331_v46 = vmax.f32 %v325_v36, %v267_v30  ;;  %v330_v50 = vmax.f32 %v324_v42, %v266_v26  ;;  %v318_v53 = vmax.f32 %v312_v44, %v263_v25  ;;  %v319_v3 = vmax.f32 %v313_v57, %v264_v45 }
  0x1d   : > { %v335_v39 = vmax.f32 %v329_v29, %v266_v26  ;;  %v332_v61 = vmax.f32 %v326_v52, %v268_v40  ;;  %v357_v13 = vrot.slane %v276_v2, 1  ;;  %v358_v22 = vrot.slane %v277_v15, 1 }
  0x1e   : > { %v337_v54 = vmax.f32 %v331_v46, %v268_v40  ;;  %v336_v60 = vmax.f32 %v330_v50, %v267_v30  ;;  %v327_v62 = vmax.f32 %v318_v53, %v301_v37  ;;  %v328_v9 = vmax.f32 %v319_v3, %v321_v58 }
  0x1f   : > { %v341_v49 = vmax.f32 %v335_v39, %v272_v20  ;;  %v338_v6 = vmax.f32 %v332_v61, %v269_v56 }
  0x20   : > { %v343_v63 = vmax.f32 %v337_v54, %v274_v31  ;;  %v342_v5 = vmax.f32 %v336_v60, %v273_v41  ;;  %v333_v7 = vmax.f32 %v327_v62, %v269_v56  ;;  %v334_v17 = vmax.f32 %v328_v9, %v270_v1 }
  0x21   : > { %v835_v59 = vmax.f32 %v341_v49, %v353_v35  ;;  %v344_v11 = vmax.f32 %v338_v6, %v275_v51 }
  0x22   : > { %v843_v8 = vmax.f32 %v343_v63, %v355_v47  ;;  %v847_v10 = vmax.f32 %v342_v5, %v354_v55  ;;  %v339_v12 = vmax.f32 %v333_v7, %v270_v1  ;;  %v340_v21 = vmax.f32 %v334_v17, %v271_v14 }
  0x23   : > { %v841_v4 = vmul.f32 %v835_v59, %v835_v59  ;;  %v859_v19 = vmax.f32 %v344_v11, %v356_v0  ;;  %v377_v63 = vlaneseq }
  0x24   : > { %v853_v16 = vmul.f32 %v843_v8, %v843_v8  ;;  %v857_v18 = vmul.f32 %v847_v10, %v847_v10  ;;  %v345_v20 = vmax.f32 %v339_v12, %v276_v2  ;;  %v346_v25 = vmax.f32 %v340_v21, %v277_v15 }
  0x25   : > { %380 = vrot.lane.b32.xlu0 %v841_v4, %s751_s5  ;;  %v867_v23 = vmul.f32 %v859_v19, %v859_v19  ;;  %v917_v2 = vand.u32 127, %v377_v63 }
  0x26   : > { %386 = vrot.lane.b32.xlu1 %v853_v16, %s751_s5  ;;  %v869_v24 = vmax.f32 %v345_v20, %v357_v13  ;;  %v877_v27 = vmax.f32 %v346_v25, %v358_v22 }
  0x27   : > { %vm416_vm1 = vcmp.lt.s32.totalorder %v917_v2, 31  ;;  %vm453_vm2 = vcmp.ge.s32.totalorder %v917_v2, 1  ;;  %vm484_vm3 = vcmp.lt.s32.totalorder %v917_v2, 30  ;;  %vm515_vm4 = vcmp.ge.s32.totalorder %v917_v2, 2 }
  0x28   : > { %v873_v26 = vmul.f32 %v869_v24, %v869_v24  ;;  %v883_v28 = vmul.f32 %v877_v27, %v877_v27 }
  0x29   : > { %383 = vrot.lane.b32.xlu0 %v857_v18, %s751_s5 }
  0x2a   : > { %389 = vrot.lane.b32.xlu1 %v867_v23, %s751_s5 }
  0x2d   : > { %392 = vrot.lane.b32.xlu0 %v873_v26, %s751_s5 }
  0x2e   : > { %395 = vrot.lane.b32.xlu1 %v883_v28, %s751_s5 }
  0x97   : > { %v381_v29 = vpop.permute.xlu0 %380 }
  0x98   : > { %v382_v30 = vsel %vm379_vm0, %v381_v29, %v841_v4  ;;  %v387_v31 = vpop.permute.xlu1 %386 }
  0x99   : > { %398 = vrot.lane.b32.xlu0 %v382_v30, %s751_s5  ;;  %v388_v33 = vsel %vm379_vm0, %v387_v31, %v853_v16 }
  0x9b   : > { %v384_v32 = vpop.permute.xlu0 %383 }
  0x9c   : > { %v385_v34 = vsel %vm379_vm0, %v384_v32, %v857_v18  ;;  %v390_v35 = vpop.permute.xlu1 %389 }
  0x9d   : > { %402 = vrot.lane.b32.xlu0 %v388_v33, %s751_s5  ;;  %400 = vrot.lane.b32.xlu1 %v385_v34, %s751_s5  ;;  %v391_v37 = vsel %vm379_vm0, %v390_v35, %v867_v23 }
  0x9f   : > { %v393_v36 = vpop.permute.xlu0 %392 }
  0xa0   : > { %v394_v38 = vsel %vm379_vm0, %v393_v36, %v873_v26  ;;  %v396_v39 = vpop.permute.xlu1 %395 }
  0xa1   : > { %404 = vrot.lane.b32.xlu1 %v391_v37, %s751_s5  ;;  %406 = vrot.lane.b32.xlu0 %v394_v38, %s751_s5  ;;  %v397_v40 = vsel %vm379_vm0, %v396_v39, %v883_v28 }
  0xa5   : > { %408 = vrot.lane.b32.xlu1 %v397_v40, %s751_s5 }
 0x10b   : > { %v399_v41 = vpop.permute.xlu0 %398 }
 0x10c   : > { %v410_v42 = vsel %vm379_vm0, %v399_v41, %v841_v4 }
 0x10d   : > { %423 = vrot.lane.b32.xlu0 %v410_v42, %s752_s6 }
 0x10f   : > { %v401_v43 = vpop.permute.xlu1 %400  ;;  %v403_v44 = vpop.permute.xlu0 %402 }
 0x110   : > { %v411_v45 = vsel %vm379_vm0, %v401_v43, %v857_v18  ;;  %v412_v46 = vsel %vm379_vm0, %v403_v44, %v853_v16 }
 0x111   : > { %425 = vrot.lane.b32.xlu1 %v411_v45, %s752_s6  ;;  %427 = vrot.lane.b32.xlu0 %v412_v46, %s752_s6 }
 0x113   : > { %v405_v47 = vpop.permute.xlu1 %404  ;;  %v407_v48 = vpop.permute.xlu0 %406 }
 0x114   : > { %v413_v49 = vsel %vm379_vm0, %v405_v47, %v867_v23  ;;  %v414_v50 = vsel %vm379_vm0, %v407_v48, %v873_v26 }
 0x115   : > { %429 = vrot.lane.b32.xlu1 %v413_v49, %s752_s6  ;;  %431 = vrot.lane.b32.xlu0 %v414_v50, %s752_s6 }
 0x117   : > { %v409_v51 = vpop.permute.xlu1 %408 }
 0x118   : > { %v415_v52 = vsel %vm379_vm0, %v409_v51, %v883_v28 }
 0x119   : > { %433 = vrot.lane.b32.xlu1 %v415_v52, %s752_s6  ;;  %454 = vrot.lane.b32.xlu0 %v410_v42, %s753_s7 }
 0x11d   : > { %456 = vrot.lane.b32.xlu1 %v411_v45, %s753_s7  ;;  %458 = vrot.lane.b32.xlu0 %v412_v46, %s753_s7 }
 0x121   : > { %460 = vrot.lane.b32.xlu1 %v413_v49, %s753_s7  ;;  %462 = vrot.lane.b32.xlu0 %v414_v50, %s753_s7 }
 0x125   : > { %464 = vrot.lane.b32.xlu1 %v415_v52, %s753_s7  ;;  %485 = vrot.lane.b32.xlu0 %v410_v42, %s754_s8 }
 0x129   : > { %487 = vrot.lane.b32.xlu1 %v411_v45, %s754_s8  ;;  %489 = vrot.lane.b32.xlu0 %v412_v46, %s754_s8 }
 0x12d   : > { %491 = vrot.lane.b32.xlu1 %v413_v49, %s754_s8  ;;  %493 = vrot.lane.b32.xlu0 %v414_v50, %s754_s8 }
 0x131   : > { %495 = vrot.lane.b32.xlu1 %v415_v52, %s754_s8  ;;  %516 = vrot.lane.b32.xlu0 %v410_v42, %s755_s9 }
 0x135   : > { %518 = vrot.lane.b32.xlu1 %v411_v45, %s755_s9  ;;  %520 = vrot.lane.b32.xlu0 %v412_v46, %s755_s9 }
 0x139   : > { %522 = vrot.lane.b32.xlu1 %v413_v49, %s755_s9  ;;  %524 = vrot.lane.b32.xlu0 %v414_v50, %s755_s9 }
 0x13d   : > { %526 = vrot.lane.b32.xlu1 %v415_v52, %s755_s9 }
 0x17f   : > { %v424_v53 = vpop.permute.xlu0 %423 }
 0x180   : > { %v441_v9 = vsel %vm416_vm1, %v424_v53, 0.0 }
 0x181   : > { %v447_v12 = vadd.f32 %v441_v9, %v841_v4 }
 0x183   : > { %v426_v54 = vpop.permute.xlu1 %425  ;;  %v428_v55 = vpop.permute.xlu0 %427 }
 0x184   : > { %v442_v13 = vsel %vm416_vm1, %v426_v54, 0.0  ;;  %v443_v17 = vsel %vm416_vm1, %v428_v55, 0.0 }
 0x185   : > { %v448_v25 = vadd.f32 %v442_v13, %v857_v18  ;;  %v449_v30 = vadd.f32 %v443_v17, %v853_v16 }
 0x187   : > { %v430_v56 = vpop.permute.xlu1 %429  ;;  %v432_v57 = vpop.permute.xlu0 %431 }
 0x188   : > { %v444_v21 = vsel %vm416_vm1, %v430_v56, 0.0  ;;  %v445_v31 = vsel %vm416_vm1, %v432_v57, 0.0 }
 0x189   : > { %v450_v36 = vadd.f32 %v444_v21, %v867_v23  ;;  %v451_v42 = vadd.f32 %v445_v31, %v873_v26 }
 0x18b   : > { %v434_v58 = vpop.permute.xlu1 %433  ;;  %v455_v60 = vpop.permute.xlu0 %454 }
 0x18c   : > { %v472_v11 = vsel %vm453_vm2, %v455_v60, 0.0  ;;  %v446_v23 = vsel %vm416_vm1, %v434_v58, 0.0 }
 0x18d   : > { %v478_v22 = vadd.f32 %v472_v11, %v447_v12  ;;  %v452_v57 = vadd.f32 %v446_v23, %v883_v28 }
 0x18f   : > { %v457_v61 = vpop.permute.xlu1 %456  ;;  %v459_v62 = vpop.permute.xlu0 %458 }
 0x190   : > { %v473_v4 = vsel %vm453_vm2, %v457_v61, 0.0  ;;  %v474_v29 = vsel %vm453_vm2, %v459_v62, 0.0 }
 0x191   : > { %v479_v38 = vadd.f32 %v473_v4, %v448_v25  ;;  %v480_v39 = vadd.f32 %v474_v29, %v449_v30 }
 0x193   : > { %v461_v0 = vpop.permute.xlu1 %460  ;;  %v463_v1 = vpop.permute.xlu0 %462 }
 0x194   : > { %v475_v32 = vsel %vm453_vm2, %v461_v0, 0.0  ;;  %v476_v40 = vsel %vm453_vm2, %v463_v1, 0.0 }
 0x195   : > { %v481_v43 = vadd.f32 %v475_v32, %v450_v36  ;;  %v482_v50 = vadd.f32 %v476_v40, %v451_v42 }
 0x197   : > { %v465_v3 = vpop.permute.xlu1 %464  ;;  %v486_v5 = vpop.permute.xlu0 %485 }
 0x198   : > { %v503_v20 = vsel %vm484_vm3, %v486_v5, 0.0  ;;  %v477_v53 = vsel %vm453_vm2, %v465_v3, 0.0 }
 0x199   : > { %v509_v33 = vadd.f32 %v503_v20, %v478_v22  ;;  %v483_v1 = vadd.f32 %v477_v53, %v452_v57 }
 0x19b   : > { %v488_v6 = vpop.permute.xlu1 %487  ;;  %v490_v7 = vpop.permute.xlu0 %489 }
 0x19c   : > { %v504_v18 = vsel %vm484_vm3, %v488_v6, 0.0  ;;  %v505_v37 = vsel %vm484_vm3, %v490_v7, 0.0 }
 0x19d   : > { %v510_v44 = vadd.f32 %v504_v18, %v479_v38  ;;  %v511_v45 = vadd.f32 %v505_v37, %v480_v39 }
 0x19f   : > { %v492_v14 = vpop.permute.xlu1 %491  ;;  %v494_v15 = vpop.permute.xlu0 %493 }
 0x1a0   : > { %v506_v46 = vsel %vm484_vm3, %v492_v14, 0.0  ;;  %v507_v51 = vsel %vm484_vm3, %v494_v15, 0.0 }
 0x1a1   : > { %v512_v58 = vadd.f32 %v506_v46, %v481_v43  ;;  %v513_v60 = vadd.f32 %v507_v51, %v482_v50 }
 0x1a3   : > { %v496_v34 = vpop.permute.xlu1 %495  ;;  %v517_v35 = vpop.permute.xlu0 %516 }
 0x1a4   : > { %v534_v16 = vsel %vm515_vm4, %v517_v35, 0.0  ;;  %v508_v5 = vsel %vm484_vm3, %v496_v34, 0.0 }
 0x1a5   : > { %v540_v41 = vadd.f32 %v534_v16, %v509_v33  ;;  %v514_v12 = vadd.f32 %v508_v5, %v483_v1 }
 0x1a7   : > { %v546_v47 = vmul.f32 2e-05, %v540_v41  ;;  %v519_v48 = vpop.permute.xlu1 %518  ;;  %v521_v49 = vpop.permute.xlu0 %520 }
 0x1a8   : > { %v535_v52 = vsel %vm515_vm4, %v519_v48, 0.0  ;;  %v536_v26 = vsel %vm515_vm4, %v521_v49, 0.0 }
 0x1a9   : > { %v552_v54 = vadd.f32 1.0, %v546_v47  ;;  %v541_v55 = vadd.f32 %v535_v52, %v510_v44  ;;  %v542_v56 = vadd.f32 %v536_v26, %v511_v45 }
 0x1ab   : > { %719 = vlog2.f32 %v552_v54  ;;  %v547_v61 = vmul.f32 2e-05, %v541_v55  ;;  %v548_v62 = vmul.f32 2e-05, %v542_v56  ;;  %v523_v63 = vpop.permute.xlu1 %522  ;;  %v525_v0 = vpop.permute.xlu0 %524 }
 0x1ac   : > { %v537_v6 = vsel %vm515_vm4, %v523_v63, 0.0  ;;  %v538_v3 = vsel %vm515_vm4, %v525_v0, 0.0 }
 0x1ad   : > { %v553_v7 = vadd.f32 1.0, %v547_v61  ;;  %v554_v9 = vadd.f32 1.0, %v548_v62  ;;  %v543_v28 = vadd.f32 %v537_v6, %v512_v58  ;;  %v544_v11 = vadd.f32 %v538_v3, %v513_v60 }
 0x1af   : > { %721 = vlog2.f32 %v553_v7  ;;  %v549_v13 = vmul.f32 2e-05, %v543_v28  ;;  %v550_v14 = vmul.f32 2e-05, %v544_v11  ;;  %v527_v15 = vpop.permute.xlu1 %526 }
 0x1b0   : > { %723 = vlog2.f32 %v554_v9  ;;  %v539_v17 = vsel %vm515_vm4, %v527_v15, 0.0 }
 0x1b1   : > { %v555_v20 = vadd.f32 1.0, %v549_v13  ;;  %v556_v21 = vadd.f32 1.0, %v550_v14  ;;  %v545_v22 = vadd.f32 %v539_v17, %v514_v12 }
 0x1b3   : > { %725 = vlog2.f32 %v555_v20  ;;  %v551_v25 = vmul.f32 2e-05, %v545_v22 }
 0x1b4   : > { %727 = vlog2.f32 %v556_v21 }
 0x1b5   : > { %v720_v4 = vpop.eup %719  ;;  %v557_v29 = vadd.f32 1.0, %v551_v25 }
 0x1b6   : > { %v559_v30 = vmul.f32 0.6931472, %v720_v4 }
 0x1b7   : > { %729 = vlog2.f32 %v557_v29 }
 0x1b8   : > { %v570_v31 = vmul.f32 -0.75, %v559_v30 }
 0x1b9   : > { %v722_v32 = vpop.eup %721 }
 0x1ba   : > { %v724_v33 = vpop.eup %723  ;;  %v576_v34 = vmul.f32 1.442695, %v570_v31  ;;  %v561_v35 = vmul.f32 0.6931472, %v722_v32 }
 0x1bb   : > { %v563_v36 = vmul.f32 0.6931472, %v724_v33 }
 0x1bc   : > { %731 = vpow2.f32 %v576_v34  ;;  %v571_v18 = vmul.f32 -0.75, %v561_v35 }
 0x1bd   : > { %v726_v2 = vpop.eup %725  ;;  %v572_v37 = vmul.f32 -0.75, %v563_v36 }
 0x1be   : > { %v728_v16 = vpop.eup %727  ;;  %v578_v38 = vmul.f32 1.442695, %v571_v18  ;;  %v565_v39 = vmul.f32 0.6931472, %v726_v2 }
 0x1bf   : > { %v580_v40 = vmul.f32 1.442695, %v572_v37  ;;  %v567_v41 = vmul.f32 0.6931472, %v728_v16 }
 0x1c0   : > { %733 = vpow2.f32 %v578_v38  ;;  %v573_v42 = vmul.f32 -0.75, %v565_v39 }
 0x1c1   : > { %v730_v23 = vpop.eup %729  ;;  %735 = vpow2.f32 %v580_v40  ;;  %v574_v43 = vmul.f32 -0.75, %v567_v41 }
 0x1c2   : > { %v582_v44 = vmul.f32 1.442695, %v573_v42  ;;  %v569_v45 = vmul.f32 0.6931472, %v730_v23 }
 0x1c3   : > { %v584_v46 = vmul.f32 1.442695, %v574_v43 }
 0x1c4   : > { %737 = vpow2.f32 %v582_v44  ;;  %v575_v47 = vmul.f32 -0.75, %v569_v45 }
 0x1c5   : > { %739 = vpow2.f32 %v584_v46 }
 0x1c6   : > { %v732_v48 = vpop.eup %731  ;;  %v586_v49 = vmul.f32 1.442695, %v575_v47 }
 0x1c7   : > { %v588_v50 = vmul.f32 %v732_v48, %v835_v59 }
 0x1c8   : > { %741 = vpow2.f32 %v586_v49 }
 0x1c9   : > { %595 = vst.msk [vmem:[%s257_s12] sm:$0x3f] %vm594_vm5, %v588_v50 }
 0x1ca   : > { %v734_v51 = vpop.eup %733 }
 0x1cb   : > { %v736_v52 = vpop.eup %735  ;;  %v589_v26 = vmul.f32 %v734_v51, %v847_v10 }
 0x1cc   : > { %v590_v53 = vmul.f32 %v736_v52, %v843_v8 }
 0x1cd   : > { %596 = vst.msk [vmem:[%s257_s12 + $0x8] sm:$0x3f] %vm594_vm5, %v589_v26 }
 0x1ce   : > { %v738_v54 = vpop.eup %737  ;;  %597 = vst.msk [vmem:[%s257_s12 + $0x10] sm:$0x3f] %vm594_vm5, %v590_v53 }
 0x1cf   : > { %v740_v55 = vpop.eup %739  ;;  %v591_v56 = vmul.f32 %v738_v54, %v859_v19 }
 0x1d0   : > { %v592_v57 = vmul.f32 %v740_v55, %v869_v24 }
 0x1d1   : > { %598 = vst.msk [vmem:[%s257_s12 + $0x18] sm:$0x3f] %vm594_vm5, %v591_v56 }
 0x1d2   : > { %v742_v59 = vpop.eup %741  ;;  %599 = vst.msk [vmem:[%s257_s12 + $0x20] sm:$0x3f] %vm594_vm5, %v592_v57 }
 0x1d3   : > { %v593_v58 = vmul.f32 %v742_v59, %v877_v27 }
 0x1d5   : > { %600 = vst.msk [vmem:[%s257_s12 + $0x28] sm:$0x3f] %vm594_vm5, %v593_v58 }
 0x1d6 PF: > { %s14_s15 = sadd.s32 1, %s749_s15  }
 0x1d7   : > { %p11_p4 = scmp.ge.s32.totalorder %s14_s15, 4  }
 0x1d9   :  { %13 = sbr.rel (!%p11_p4) target bundleno = 1 (0x1), region = 75 }

// kernel: _lambda_.5
= control target key start
LH: loop header
LB: loop body
LE: loop exit
PB: predicated region body
PF: predicated region fallthrough
CT: control target
= control target key end

     0   :  { %s1250_s12 = smov 0   ;;  %s1252_s13 = smov 0   ;;  %s1498_s0 = inlined_call_operand.vmem [shape: bf16[1,512,128], index: 0, kind: input, shape index: {}]   ;;  %s1499_s1 = inlined_call_operand.vmem [shape: bf16[1,128,32], index: 1, kind: input, shape index: {}]   ;;  %s1500_s2 = inlined_call_operand.vmem [shape: f32[1,1,32], index: 2, kind: input, shape index: {}]   ;;  %s1501_s3 = inlined_call_operand.vmem [shape: f32[1,512,32], index: 3, kind: output, shape index: {}]  }
   0x1   :  { %s1254_s14 = smov 0  }
   0x2 LB: > { %s28_s15 = sadd.s32 1, %s1223_s13  ;;  %p1036_p0 = scmp.ge.s32.totalorder %s1227_s14, 1  ;;  %s1227_s14 = sphi %s1254_s14, %s13_s14   ;;  %s1223_s13 = sphi %s1252_s13, %s1503_s13   ;;  %s1219_s12 = sphi %s1250_s12, %s1502_s12  }
   0x3   : > { %p30_p1 = scmp.ge.s32.totalorder %s28_s15, 2  ;;  %p195_p2 = scmp.lt.s32.totalorder %s1227_s14, 3 }
   0x5   : > { %s1505_s15 = smov (%p30_p1, %s28_s15), 0  ;;  %p196_p3 = pnand %p1036_p0, %p195_p2 }
   0x6   : > { %v1181_v0 = vld [vmem:[%s1499_s1] sm:$0xff] (!%p196_p3)   ;;  %s1037_s18 = sshll.u32 (!%p196_p3), %s1219_s12, 5  ;;  %v1182_v1 = vld [vmem:[%s1499_s1 + $0x8] sm:$0xff] (!%p196_p3)   ;;  %vm283_vm0 = vcmask (!%p196_p3), 261120   ;;  %v1183_v2 = vld [vmem:[%s1499_s1 + $0x10] sm:$0xff] (!%p196_p3)   ;;  %v1229_v3 = vmov (!%p196_p3), 0.0  }
   0x7   : > { %199 = sbr.rel (%p196_p3) target bundleno = 294 (0x126), region = 32  ;;  %p245_p4 = scmp.lt.s32.totalorder (!%p196_p3), %s1037_s18, 63  ;;  %1092 = vmatprep.subr.bf16.mxu0 (!%p196_p3), %v1181_v0  ;;  %1140 = vmatprep.subr.bf16.mxu1 (!%p196_p3), %v1181_v0  ;;  %286 = vst.msk [vmem:[#allocation2 + $0x10] sm:$0xff] (!%p196_p3), %vm283_vm0, %v1229_v3  ;;  %284 = vst.msk [vmem:[#allocation2] sm:$0xff] (!%p196_p3), %vm283_vm0, %v1229_v3  ;;  %v1184_v4 = vld [vmem:[%s1499_s1 + $0x18] sm:$0xff] (!%p196_p3)   ;;  %v1185_v7 = vld [vmem:[%s1499_s1 + $0x20] sm:$0xff] (!%p196_p3)  }
   0x8   : > { %1093 = vmatpush3.bf16.msra.mxu0 (!%p196_p3), %v1181_v0  ;;  %1148 = vmatpush3.bf16.msra.mxu1 (!%p196_p3), %v1181_v0  ;;  %285 = vst.msk [vmem:[#allocation2 + $0x8] sm:$0xff] (!%p196_p3), %vm283_vm0, %v1229_v3  ;;  %287 = vst.msk [vmem:[#allocation2 + $0x18] sm:$0xff] (!%p196_p3), %vm283_vm0, %v1229_v3  ;;  %v1186_v8 = vld [vmem:[%s1499_s1 + $0x28] sm:$0xff] (!%p196_p3)   ;;  %v1187_v9 = vld [vmem:[%s1499_s1 + $0x30] sm:$0xff] (!%p196_p3)  }
   0x9   : > { %1094 = vmatprep.subr.bf16.mxu0 (!%p196_p3), %v1182_v1  ;;  %1141 = vmatprep.subr.bf16.mxu1 (!%p196_p3), %v1182_v1  ;;  %288 = vst.msk [vmem:[#allocation2 + $0x20] sm:$0xff] (!%p196_p3), %vm283_vm0, %v1229_v3  ;;  %289 = vst.msk [vmem:[#allocation2 + $0x28] sm:$0xff] (!%p196_p3), %vm283_vm0, %v1229_v3  ;;  %v1188_v10 = vld [vmem:[%s1499_s1 + $0x38] sm:$0xff] (!%p196_p3)   ;;  %v1361_v53 = vld [vmem:[%s1500_s2] ss:$0 sm:$0xff] (!%p196_p3) }
   0xa   : > { %290 = vst.msk [vmem:[#allocation2 + $0x30] sm:$0xff] (!%p196_p3), %vm283_vm0, %v1229_v3  ;;  %291 = vst.msk [vmem:[#allocation2 + $0x38] sm:$0xff] (!%p196_p3), %vm283_vm0, %v1229_v3 }
   0xb   : > { %292 = vst.msk [vmem:[#allocation2 + $0x40] sm:$0xff] (!%p196_p3), %vm283_vm0, %v1229_v3  ;;  %293 = vst.msk [vmem:[#allocation2 + $0x48] sm:$0xff] (!%p196_p3), %vm283_vm0, %v1229_v3 }
   0xc   : > { %294 = vst.msk [vmem:[#allocation2 + $0x50] sm:$0xff] (!%p196_p3), %vm283_vm0, %v1229_v3  ;;  %295 = vst.msk [vmem:[#allocation2 + $0x58] sm:$0xff] (!%p196_p3), %vm283_vm0, %v1229_v3  ;;  %1095 = vmatpush3.bf16.msra.mxu0 (!%p196_p3), %v1182_v1  ;;  %1149 = vmatpush3.bf16.msra.mxu1 (!%p196_p3), %v1182_v1 }
   0xd   : > { %296 = vst.msk [vmem:[#allocation2 + $0x60] sm:$0xff] (!%p196_p3), %vm283_vm0, %v1229_v3  ;;  %297 = vst.msk [vmem:[#allocation2 + $0x68] sm:$0xff] (!%p196_p3), %vm283_vm0, %v1229_v3  ;;  %1096 = vmatprep.subr.bf16.mxu0 (!%p196_p3), %v1183_v2  ;;  %1142 = vmatprep.subr.bf16.mxu1 (!%p196_p3), %v1183_v2 }
   0xe   : > { %s1507_s18 = smov (!%p245_p4, %s1037_s18), 63  ;;  %298 = vst.msk [vmem:[#allocation2 + $0x70] sm:$0xff] %vm283_vm0, %v1229_v3  ;;  %299 = vst.msk [vmem:[#allocation2 + $0x78] sm:$0xff] %vm283_vm0, %v1229_v3  ;;  %v318_v25 = vld [vmem:[#allocation2 + $0x10] sm:$0xff]  ;;  %v316_v27 = vld [vmem:[#allocation2] sm:$0xff] }
   0xf   : > { %s1038_s23 = sshll.u32 %s1507_s18, 2  ;;  %300 = vst.msk [vmem:[#allocation2 + $0x80] sm:$0xff] %vm283_vm0, %v1229_v3  ;;  %301 = vst.msk [vmem:[#allocation2 + $0x88] sm:$0xff] %vm283_vm0, %v1229_v3  ;;  %v319_v31 = vld [vmem:[#allocation2 + $0x18] sm:$0xff]  ;;  %v317_v37 = vld [vmem:[#allocation2 + $0x8] sm:$0xff]  ;;  %s1040_s12 = sshll.u32 %s1507_s18, 3 }
  0x10   : > { %302 = vst.msk [vmem:[#allocation2 + $0x90] sm:$0xff] %vm283_vm0, %v1229_v3  ;;  %303 = vst.msk [vmem:[#allocation2 + $0x98] sm:$0xff] %vm283_vm0, %v1229_v3  ;;  %s1317_s26 = scalar_lea.vmem %s1498_s0, %s1038_s23  ;;  %1097 = vmatpush3.bf16.msra.mxu0 %v1183_v2  ;;  %1150 = vmatpush3.bf16.msra.mxu1 %v1183_v2  ;;  %v320_v51 = vld [vmem:[#allocation2 + $0x20] sm:$0xff]  ;;  %v321_v62 = vld [vmem:[#allocation2 + $0x28] sm:$0xff]  ;;  %s1371_s18 = scalar_lea.vmem %s1501_s3, %s1040_s12 }
  0x11   : > { %304 = vst.msk [vmem:[#allocation2 + $0xa0] sm:$0xff] %vm283_vm0, %v1229_v3  ;;  %305 = vst.msk [vmem:[#allocation2 + $0xa8] sm:$0xff] %vm283_vm0, %v1229_v3  ;;  %v1189_v5 = vld [vmem:[%s1317_s26] sm:$0xff]   ;;  %1098 = vmatprep.subr.bf16.mxu0 %v1184_v4  ;;  %1143 = vmatprep.subr.bf16.mxu1 %v1184_v4  ;;  %v1191_v11 = vld [vmem:[%s1317_s26 + $0x8] sm:$0xff]  }
  0x12   : > { %306 = vst.msk [vmem:[#allocation2 + $0xb0] sm:$0xff] %vm283_vm0, %v1229_v3  ;;  %307 = vst.msk [vmem:[#allocation2 + $0xb8] sm:$0xff] %vm283_vm0, %v1229_v3  ;;  %v1190_v6 = vld [vmem:[%s1317_s26 + $0x40] sm:$0xff]   ;;  %1108 = vmatprep.mubr.bf16.mxu0 %v1189_v5  ;;  %v1192_v12 = vld [vmem:[%s1317_s26 + $0x48] sm:$0xff]  }
  0x13   : > { %308 = vst.msk [vmem:[#allocation2 + $0xc0] sm:$0xff] %vm283_vm0, %v1229_v3  ;;  %309 = vst.msk [vmem:[#allocation2 + $0xc8] sm:$0xff] %vm283_vm0, %v1229_v3  ;;  %1124 = vmatprep.mubr.bf16.mxu1 %v1190_v6  ;;  %v1193_v13 = vld [vmem:[%s1317_s26 + $0x10] sm:$0xff]   ;;  %v1195_v15 = vld [vmem:[%s1317_s26 + $0x18] sm:$0xff]  }
  0x14   : > { %310 = vst.msk [vmem:[#allocation2 + $0xd0] sm:$0xff] %vm283_vm0, %v1229_v3  ;;  %311 = vst.msk [vmem:[#allocation2 + $0xd8] sm:$0xff] %vm283_vm0, %v1229_v3  ;;  %1099 = vmatpush3.bf16.msra.mxu0 %v1184_v4  ;;  %1151 = vmatpush3.bf16.msra.mxu1 %v1184_v4  ;;  %v1194_v14 = vld [vmem:[%s1317_s26 + $0x50] sm:$0xff]   ;;  %v1196_v16 = vld [vmem:[%s1317_s26 + $0x58] sm:$0xff]  }
  0x15   : > { %312 = vst.msk [vmem:[#allocation2 + $0xe0] sm:$0xff] %vm283_vm0, %v1229_v3  ;;  %313 = vst.msk [vmem:[#allocation2 + $0xe8] sm:$0xff] %vm283_vm0, %v1229_v3  ;;  %1100 = vmatprep.subr.bf16.mxu0 %v1185_v7  ;;  %1144 = vmatprep.subr.bf16.mxu1 %v1185_v7  ;;  %v1197_v17 = vld [vmem:[%s1317_s26 + $0x20] sm:$0xff]   ;;  %v1199_v19 = vld [vmem:[%s1317_s26 + $0x28] sm:$0xff]  }
  0x16   : > { %314 = vst.msk [vmem:[#allocation2 + $0xf0] sm:$0xff] %vm283_vm0, %v1229_v3  ;;  %315 = vst.msk [vmem:[#allocation2 + $0xf8] sm:$0xff] %vm283_vm0, %v1229_v3  ;;  %v1198_v18 = vld [vmem:[%s1317_s26 + $0x60] sm:$0xff]   ;;  %v1200_v20 = vld [vmem:[%s1317_s26 + $0x68] sm:$0xff]  }
  0x17   : > { %v1201_v21 = vld [vmem:[%s1317_s26 + $0x30] sm:$0xff]   ;;  %v1203_v23 = vld [vmem:[%s1317_s26 + $0x38] sm:$0xff]   ;;  %v332_v28 = vld [vmem:[#allocation2 + $0x80] sm:$0xff] }
  0x18   : > { %1101 = vmatpush3.bf16.msra.mxu0 %v1185_v7  ;;  %1152 = vmatpush3.bf16.msra.mxu1 %v1185_v7  ;;  %v1202_v22 = vld [vmem:[%s1317_s26 + $0x70] sm:$0xff]   ;;  %v1204_v24 = vld [vmem:[%s1317_s26 + $0x78] sm:$0xff]   ;;  %v333_v38 = vld [vmem:[#allocation2 + $0x88] sm:$0xff] }
  0x19   : > { %1102 = vmatprep.subr.bf16.mxu0 %v1186_v8  ;;  %1145 = vmatprep.subr.bf16.mxu1 %v1186_v8  ;;  %v334_v26 = vld [vmem:[#allocation2 + $0x90] sm:$0xff]  ;;  %v335_v32 = vld [vmem:[#allocation2 + $0x98] sm:$0xff]  ;;  %v336_v52 = vld [vmem:[#allocation2 + $0xa0] sm:$0xff] }
  0x1a   : > { %v322_v49 = vld [vmem:[#allocation2 + $0x30] sm:$0xff]  ;;  %v323_v56 = vld [vmem:[#allocation2 + $0x38] sm:$0xff]  ;;  %v337_v63 = vld [vmem:[#allocation2 + $0xa8] sm:$0xff] }
  0x1b   : > { %v338_v50 = vld [vmem:[#allocation2 + $0xb0] sm:$0xff]  ;;  %v339_v57 = vld [vmem:[#allocation2 + $0xb8] sm:$0xff] }
  0x1c   : > { %1103 = vmatpush3.bf16.msra.mxu0 %v1186_v8  ;;  %1153 = vmatpush3.bf16.msra.mxu1 %v1186_v8 }
  0x1d   : > { %1104 = vmatprep.subr.bf16.mxu0 %v1187_v9  ;;  %1146 = vmatprep.subr.bf16.mxu1 %v1187_v9 }
  0x20   : > { %1105 = vmatpush3.bf16.msra.mxu0 %v1187_v9  ;;  %1154 = vmatpush3.bf16.msra.mxu1 %v1187_v9 }
  0x21   : > { %1106 = vmatprep.subr.bf16.mxu0 %v1188_v10  ;;  %1147 = vmatprep.subr.bf16.mxu1 %v1188_v10 }
  0x24   : > { %1107 = vmatpush3.bf16.msra.mxu0 %v1188_v10  ;;  %1155 = vmatpush3.bf16.msra.mxu1 %v1188_v10 }
  0x27   : > { %1109 = vmatmul.mubr.bf16.vlgmr.msra.gmra.mrb[0].mxu0 %v1191_v11  ;;  %1125 = vmatmul.mubr.bf16.vlgmr.msra.gmra.mrb[0].mxu1 %v1192_v12 }
  0x28   : > { %1112 = vmatprep.mubr.bf16.mxu0 %v1193_v13  ;;  %1128 = vmatprep.mubr.bf16.mxu1 %v1194_v14 }
  0x2f   : > { %1113 = vmatmul.mubr.bf16.gmra.mrb[4].mxu0 %v1195_v15  ;;  %1129 = vmatmul.mubr.bf16.gmra.mrb[4].mxu1 %v1196_v16 }
  0x30   : > { %1116 = vmatprep.mubr.bf16.mxu0 %v1197_v17  ;;  %1132 = vmatprep.mubr.bf16.mxu1 %v1198_v18 }
  0x37   : > { %1117 = vmatmul.mubr.bf16.gmra.mrb[8].mxu0 %v1199_v19  ;;  %1133 = vmatmul.mubr.bf16.gmra.mrb[8].mxu1 %v1200_v20 }
  0x38   : > { %1120 = vmatprep.mubr.bf16.mxu0 %v1201_v21  ;;  %1136 = vmatprep.mubr.bf16.mxu1 %v1202_v22 }
  0x3f   : > { %1121 = vmatmul.mubr.bf16.gmra.mrb[12].mxu0 %v1203_v23  ;;  %1137 = vmatmul.mubr.bf16.gmra.mrb[12].mxu1 %v1204_v24 }
  0xfa   : > { %v1110_v29 = vpop.f32.mrb[0].mxu0  ;;  %v1126_v30 = vpop.f32.mrb[0].mxu1 }
  0xfb   : > { %v703_v33 = vadd.f32 %v1110_v29, %v318_v25  ;;  %v719_v34 = vadd.f32 %v1126_v30, %v334_v26  ;;  %v574_v35 = vpop.f32.mrb[1].mxu0  ;;  %v638_v36 = vpop.f32.mrb[1].mxu1  ;;  %v326_v30 = vld [vmem:[#allocation2 + $0x50] sm:$0xff] }
  0xfc   : > { %v701_v39 = vadd.f32 %v574_v35, %v316_v27  ;;  %v717_v40 = vadd.f32 %v638_v36, %v332_v28  ;;  %v1111_v41 = vpop.f32.mrb[2].mxu0  ;;  %v1127_v42 = vpop.f32.mrb[2].mxu1  ;;  %v340_v35 = vld [vmem:[#allocation2 + $0xc0] sm:$0xff] }
  0xfd   : > { %736 = vst.msk [vmem:[#allocation2 + $0x10] sm:$0xff] %vm283_vm0, %v703_v33  ;;  %752 = vst.msk [vmem:[#allocation2 + $0x90] sm:$0xff] %vm283_vm0, %v719_v34  ;;  %v704_v43 = vadd.f32 %v1111_v41, %v319_v31  ;;  %v720_v44 = vadd.f32 %v1127_v42, %v335_v32  ;;  %v577_v45 = vpop.f32.mrb[3].mxu0  ;;  %v641_v46 = vpop.f32.mrb[3].mxu1  ;;  %v342_v31 = vld [vmem:[#allocation2 + $0xd0] sm:$0xff]  ;;  %v324_v34 = vld [vmem:[#allocation2 + $0x40] sm:$0xff] }
  0xfe   : > { %734 = vst.msk [vmem:[#allocation2] sm:$0xff] %vm283_vm0, %v701_v39  ;;  %750 = vst.msk [vmem:[#allocation2 + $0x80] sm:$0xff] %vm283_vm0, %v717_v40  ;;  %v702_v47 = vadd.f32 %v577_v45, %v317_v37  ;;  %v718_v48 = vadd.f32 %v641_v46, %v333_v38  ;;  %v327_v40 = vld [vmem:[#allocation2 + $0x58] sm:$0xff]  ;;  %v325_v46 = vld [vmem:[#allocation2 + $0x48] sm:$0xff] }
  0xff   : > { %737 = vst.msk [vmem:[#allocation2 + $0x18] sm:$0xff] %vm283_vm0, %v704_v43  ;;  %753 = vst.msk [vmem:[#allocation2 + $0x98] sm:$0xff] %vm283_vm0, %v720_v44  ;;  %v343_v41 = vld [vmem:[#allocation2 + $0xd8] sm:$0xff] }
 0x100   : > { %735 = vst.msk [vmem:[#allocation2 + $0x8] sm:$0xff] %vm283_vm0, %v702_v47  ;;  %751 = vst.msk [vmem:[#allocation2 + $0x88] sm:$0xff] %vm283_vm0, %v718_v48  ;;  %v341_v47 = vld [vmem:[#allocation2 + $0xc8] sm:$0xff] }
 0x102   : > { %v1114_v54 = vpop.f32.mrb[4].mxu0  ;;  %v1130_v55 = vpop.f32.mrb[4].mxu1 }
 0x103   : > { %v707_v58 = vadd.f32 %v1114_v54, %v322_v49  ;;  %v723_v59 = vadd.f32 %v1130_v55, %v338_v50  ;;  %v590_v60 = vpop.f32.mrb[5].mxu0  ;;  %v654_v61 = vpop.f32.mrb[5].mxu1 }
 0x104   : > { %v771_v0 = vld [vmem:[#allocation2 + $0x10] sm:$0xff]  ;;  %v705_v2 = vadd.f32 %v590_v60, %v320_v51  ;;  %v721_v3 = vadd.f32 %v654_v61, %v336_v52  ;;  %v1115_v4 = vpop.f32.mrb[6].mxu0  ;;  %v1131_v5 = vpop.f32.mrb[6].mxu1 }
 0x105   : > { %v787_v1 = vld [vmem:[#allocation2 + $0x90] sm:$0xff]  ;;  %v810_v6 = vadd.f32 %v1361_v53, %v771_v0  ;;  %v769_v8 = vld [vmem:[#allocation2] sm:$0xff]  ;;  %740 = vst.msk [vmem:[#allocation2 + $0x30] sm:$0xff] %vm283_vm0, %v707_v58  ;;  %756 = vst.msk [vmem:[#allocation2 + $0xb0] sm:$0xff] %vm283_vm0, %v723_v59  ;;  %v708_v10 = vadd.f32 %v1115_v4, %v323_v56  ;;  %v724_v11 = vadd.f32 %v1131_v5, %v339_v57  ;;  %v593_v12 = vpop.f32.mrb[7].mxu0  ;;  %v657_v13 = vpop.f32.mrb[7].mxu1 }
 0x106   : > { %v826_v7 = vadd.f32 %v1361_v53, %v787_v1  ;;  %v785_v9 = vld [vmem:[#allocation2 + $0x80] sm:$0xff]  ;;  %v808_v14 = vadd.f32 %v1361_v53, %v769_v8  ;;  %v772_v16 = vld [vmem:[#allocation2 + $0x18] sm:$0xff]  ;;  %738 = vst.msk [vmem:[#allocation2 + $0x20] sm:$0xff] %vm283_vm0, %v705_v2  ;;  %754 = vst.msk [vmem:[#allocation2 + $0xa0] sm:$0xff] %vm283_vm0, %v721_v3  ;;  %v706_v18 = vadd.f32 %v593_v12, %v321_v62 }
 0x107   : > { %v824_v15 = vadd.f32 %v1361_v53, %v785_v9  ;;  %v788_v17 = vld [vmem:[#allocation2 + $0x98] sm:$0xff]  ;;  %v722_v19 = vadd.f32 %v657_v13, %v337_v63  ;;  %v842_v20 = vmax.f32 %v810_v6, 0.0  ;;  %v811_v22 = vadd.f32 %v1361_v53, %v772_v16  ;;  %v770_v24 = vld [vmem:[#allocation2 + $0x8] sm:$0xff]  ;;  %741 = vst.msk [vmem:[#allocation2 + $0x38] sm:$0xff] %vm283_vm0, %v708_v10  ;;  %757 = vst.msk [vmem:[#allocation2 + $0xb8] sm:$0xff] %vm283_vm0, %v724_v11 }
 0x108   : > { %v858_v21 = vmax.f32 %v826_v7, 0.0  ;;  %v827_v23 = vadd.f32 %v1361_v53, %v788_v17  ;;  %v786_v25 = vld [vmem:[#allocation2 + $0x88] sm:$0xff]  ;;  %v840_v26 = vmax.f32 %v808_v14, 0.0  ;;  %v809_v28 = vadd.f32 %v1361_v53, %v770_v24  ;;  %739 = vst.msk [vmem:[#allocation2 + $0x28] sm:$0xff] %vm283_vm0, %v706_v18  ;;  %v346_v16 = vld [vmem:[#allocation2 + $0xf0] sm:$0xff] }
 0x109   : > { %v856_v27 = vmax.f32 %v824_v15, 0.0  ;;  %v825_v29 = vadd.f32 %v1361_v53, %v786_v25  ;;  %755 = vst.msk [vmem:[#allocation2 + $0xa8] sm:$0xff] %vm283_vm0, %v722_v19  ;;  %874 = vst.msk [vmem:[%s1371_s18 + $0x10] sm:$0xff] %vm283_vm0, %v842_v20  ;;  %v843_v32 = vmax.f32 %v811_v22, 0.0  ;;  %v330_v15 = vld [vmem:[#allocation2 + $0x70] sm:$0xff]  ;;  %v328_v19 = vld [vmem:[#allocation2 + $0x60] sm:$0xff] }
 0x10a   : > { %890 = vst.msk [vmem:[%s1371_s18 + $0x90] sm:$0xff] %vm283_vm0, %v858_v21  ;;  %v859_v33 = vmax.f32 %v827_v23, 0.0  ;;  %872 = vst.msk [vmem:[%s1371_s18] sm:$0xff] %vm283_vm0, %v840_v26  ;;  %v841_v36 = vmax.f32 %v809_v28, 0.0  ;;  %v1118_v38 = vpop.f32.mrb[8].mxu0  ;;  %v1134_v39 = vpop.f32.mrb[8].mxu1 }
 0x10b   : > { %888 = vst.msk [vmem:[%s1371_s18 + $0x80] sm:$0xff] %vm283_vm0, %v856_v27  ;;  %v857_v37 = vmax.f32 %v825_v29, 0.0  ;;  %875 = vst.msk [vmem:[%s1371_s18 + $0x18] sm:$0xff] %vm283_vm0, %v843_v32  ;;  %v711_v42 = vadd.f32 %v1118_v38, %v326_v30  ;;  %v727_v43 = vadd.f32 %v1134_v39, %v342_v31  ;;  %v606_v44 = vpop.f32.mrb[9].mxu0  ;;  %v670_v45 = vpop.f32.mrb[9].mxu1  ;;  %v344_v20 = vld [vmem:[#allocation2 + $0xe0] sm:$0xff] }
 0x10c   : > { %891 = vst.msk [vmem:[%s1371_s18 + $0x98] sm:$0xff] %vm283_vm0, %v859_v33  ;;  %873 = vst.msk [vmem:[%s1371_s18 + $0x8] sm:$0xff] %vm283_vm0, %v841_v36  ;;  %v775_v48 = vld [vmem:[#allocation2 + $0x30] sm:$0xff]  ;;  %v709_v50 = vadd.f32 %v606_v44, %v324_v34  ;;  %v725_v51 = vadd.f32 %v670_v45, %v340_v35  ;;  %v1119_v52 = vpop.f32.mrb[10].mxu0  ;;  %v1135_v54 = vpop.f32.mrb[10].mxu1  ;;  %v331_v25 = vld [vmem:[#allocation2 + $0x78] sm:$0xff] }
 0x10d   : > { %889 = vst.msk [vmem:[%s1371_s18 + $0x88] sm:$0xff] %vm283_vm0, %v857_v37  ;;  %v791_v49 = vld [vmem:[#allocation2 + $0xb0] sm:$0xff]  ;;  %v814_v55 = vadd.f32 %v1361_v53, %v775_v48  ;;  %v773_v57 = vld [vmem:[#allocation2 + $0x20] sm:$0xff]  ;;  %744 = vst.msk [vmem:[#allocation2 + $0x50] sm:$0xff] %vm283_vm0, %v711_v42  ;;  %v712_v59 = vadd.f32 %v1119_v52, %v327_v40  ;;  %v728_v60 = vadd.f32 %v1135_v54, %v343_v41  ;;  %v609_v61 = vpop.f32.mrb[11].mxu0  ;;  %v673_v62 = vpop.f32.mrb[11].mxu1 }
 0x10e   : > { %v830_v56 = vadd.f32 %v1361_v53, %v791_v49  ;;  %v789_v58 = vld [vmem:[#allocation2 + $0xa0] sm:$0xff]  ;;  %760 = vst.msk [vmem:[#allocation2 + $0xd0] sm:$0xff] %vm283_vm0, %v727_v43  ;;  %v812_v63 = vadd.f32 %v1361_v53, %v773_v57  ;;  %v776_v1 = vld [vmem:[#allocation2 + $0x38] sm:$0xff]  ;;  %742 = vst.msk [vmem:[#allocation2 + $0x40] sm:$0xff] %vm283_vm0, %v709_v50  ;;  %v710_v3 = vadd.f32 %v609_v61, %v325_v46 }
 0x10f   : > { %v828_v0 = vadd.f32 %v1361_v53, %v789_v58  ;;  %v792_v2 = vld [vmem:[#allocation2 + $0xb8] sm:$0xff]  ;;  %758 = vst.msk [vmem:[#allocation2 + $0xc0] sm:$0xff] %vm283_vm0, %v725_v51  ;;  %v726_v4 = vadd.f32 %v673_v62, %v341_v47  ;;  %v846_v5 = vmax.f32 %v814_v55, 0.0  ;;  %v815_v7 = vadd.f32 %v1361_v53, %v776_v1  ;;  %v774_v9 = vld [vmem:[#allocation2 + $0x28] sm:$0xff]  ;;  %745 = vst.msk [vmem:[#allocation2 + $0x58] sm:$0xff] %vm283_vm0, %v712_v59 }
 0x110   : > { %v862_v6 = vmax.f32 %v830_v56, 0.0  ;;  %v831_v8 = vadd.f32 %v1361_v53, %v792_v2  ;;  %v790_v10 = vld [vmem:[#allocation2 + $0xa8] sm:$0xff]  ;;  %761 = vst.msk [vmem:[#allocation2 + $0xd8] sm:$0xff] %vm283_vm0, %v728_v60  ;;  %v844_v11 = vmax.f32 %v812_v63, 0.0  ;;  %v813_v13 = vadd.f32 %v1361_v53, %v774_v9  ;;  %743 = vst.msk [vmem:[#allocation2 + $0x48] sm:$0xff] %vm283_vm0, %v710_v3  ;;  %v347_v26 = vld [vmem:[#allocation2 + $0xf8] sm:$0xff] }
 0x111   : > { %v860_v12 = vmax.f32 %v828_v0, 0.0  ;;  %v829_v14 = vadd.f32 %v1361_v53, %v790_v10  ;;  %759 = vst.msk [vmem:[#allocation2 + $0xc8] sm:$0xff] %vm283_vm0, %v726_v4  ;;  %878 = vst.msk [vmem:[%s1371_s18 + $0x30] sm:$0xff] %vm283_vm0, %v846_v5  ;;  %v847_v17 = vmax.f32 %v815_v7, 0.0  ;;  %v329_v31 = vld [vmem:[#allocation2 + $0x68] sm:$0xff] }
 0x112   : > { %894 = vst.msk [vmem:[%s1371_s18 + $0xb0] sm:$0xff] %vm283_vm0, %v862_v6  ;;  %v863_v18 = vmax.f32 %v831_v8, 0.0  ;;  %876 = vst.msk [vmem:[%s1371_s18 + $0x20] sm:$0xff] %vm283_vm0, %v844_v11  ;;  %v845_v21 = vmax.f32 %v813_v13, 0.0  ;;  %v1122_v23 = vpop.f32.mrb[12].mxu0  ;;  %v1138_v24 = vpop.f32.mrb[12].mxu1 }
 0x113   : > { %892 = vst.msk [vmem:[%s1371_s18 + $0xa0] sm:$0xff] %vm283_vm0, %v860_v12  ;;  %v861_v22 = vmax.f32 %v829_v14, 0.0  ;;  %879 = vst.msk [vmem:[%s1371_s18 + $0x38] sm:$0xff] %vm283_vm0, %v847_v17  ;;  %v715_v27 = vadd.f32 %v1122_v23, %v330_v15  ;;  %v731_v28 = vadd.f32 %v1138_v24, %v346_v16  ;;  %v622_v29 = vpop.f32.mrb[13].mxu0  ;;  %v686_v30 = vpop.f32.mrb[13].mxu1  ;;  %v345_v32 = vld [vmem:[#allocation2 + $0xe8] sm:$0xff] }
 0x114   : > { %895 = vst.msk [vmem:[%s1371_s18 + $0xb8] sm:$0xff] %vm283_vm0, %v863_v18  ;;  %877 = vst.msk [vmem:[%s1371_s18 + $0x28] sm:$0xff] %vm283_vm0, %v845_v21  ;;  %v779_v33 = vld [vmem:[#allocation2 + $0x50] sm:$0xff]  ;;  %v713_v35 = vadd.f32 %v622_v29, %v328_v19  ;;  %v729_v36 = vadd.f32 %v686_v30, %v344_v20  ;;  %v1123_v37 = vpop.f32.mrb[14].mxu0  ;;  %v1139_v38 = vpop.f32.mrb[14].mxu1 }
 0x115   : > { %893 = vst.msk [vmem:[%s1371_s18 + $0xa8] sm:$0xff] %vm283_vm0, %v861_v22  ;;  %v795_v34 = vld [vmem:[#allocation2 + $0xd0] sm:$0xff]  ;;  %v818_v39 = vadd.f32 %v1361_v53, %v779_v33  ;;  %v777_v41 = vld [vmem:[#allocation2 + $0x40] sm:$0xff]  ;;  %748 = vst.msk [vmem:[#allocation2 + $0x70] sm:$0xff] %vm283_vm0, %v715_v27  ;;  %v716_v43 = vadd.f32 %v1123_v37, %v331_v25  ;;  %v732_v44 = vadd.f32 %v1139_v38, %v347_v26  ;;  %v625_v45 = vpop.f32.mrb[15].mxu0  ;;  %v689_v46 = vpop.f32.mrb[15].mxu1 }
 0x116   : > { %v834_v40 = vadd.f32 %v1361_v53, %v795_v34  ;;  %v793_v42 = vld [vmem:[#allocation2 + $0xc0] sm:$0xff]  ;;  %764 = vst.msk [vmem:[#allocation2 + $0xf0] sm:$0xff] %vm283_vm0, %v731_v28  ;;  %v816_v47 = vadd.f32 %v1361_v53, %v777_v41  ;;  %v780_v49 = vld [vmem:[#allocation2 + $0x58] sm:$0xff]  ;;  %746 = vst.msk [vmem:[#allocation2 + $0x60] sm:$0xff] %vm283_vm0, %v713_v35  ;;  %v714_v51 = vadd.f32 %v625_v45, %v329_v31 }
 0x117   : > { %v832_v48 = vadd.f32 %v1361_v53, %v793_v42  ;;  %v796_v50 = vld [vmem:[#allocation2 + $0xd8] sm:$0xff]  ;;  %762 = vst.msk [vmem:[#allocation2 + $0xe0] sm:$0xff] %vm283_vm0, %v729_v36  ;;  %v730_v52 = vadd.f32 %v689_v46, %v345_v32  ;;  %v850_v54 = vmax.f32 %v818_v39, 0.0  ;;  %v819_v56 = vadd.f32 %v1361_v53, %v780_v49  ;;  %v778_v58 = vld [vmem:[#allocation2 + $0x48] sm:$0xff]  ;;  %749 = vst.msk [vmem:[#allocation2 + $0x78] sm:$0xff] %vm283_vm0, %v716_v43 }
 0x118   : > { %v866_v55 = vmax.f32 %v834_v40, 0.0  ;;  %v835_v57 = vadd.f32 %v1361_v53, %v796_v50  ;;  %v794_v59 = vld [vmem:[#allocation2 + $0xc8] sm:$0xff]  ;;  %765 = vst.msk [vmem:[#allocation2 + $0xf8] sm:$0xff] %vm283_vm0, %v732_v44  ;;  %v848_v60 = vmax.f32 %v816_v47, 0.0  ;;  %v817_v62 = vadd.f32 %v1361_v53, %v778_v58  ;;  %747 = vst.msk [vmem:[#allocation2 + $0x68] sm:$0xff] %vm283_vm0, %v714_v51 }
 0x119   : > { %v864_v61 = vmax.f32 %v832_v48, 0.0  ;;  %v833_v63 = vadd.f32 %v1361_v53, %v794_v59  ;;  %763 = vst.msk [vmem:[#allocation2 + $0xe8] sm:$0xff] %vm283_vm0, %v730_v52  ;;  %882 = vst.msk [vmem:[%s1371_s18 + $0x50] sm:$0xff] %vm283_vm0, %v850_v54  ;;  %v851_v0 = vmax.f32 %v819_v56, 0.0 }
 0x11a   : > { %898 = vst.msk [vmem:[%s1371_s18 + $0xd0] sm:$0xff] %vm283_vm0, %v866_v55  ;;  %v867_v1 = vmax.f32 %v835_v57, 0.0  ;;  %880 = vst.msk [vmem:[%s1371_s18 + $0x40] sm:$0xff] %vm283_vm0, %v848_v60  ;;  %v849_v2 = vmax.f32 %v817_v62, 0.0 }
 0x11b   : > { %896 = vst.msk [vmem:[%s1371_s18 + $0xc0] sm:$0xff] %vm283_vm0, %v864_v61  ;;  %v865_v3 = vmax.f32 %v833_v63, 0.0  ;;  %883 = vst.msk [vmem:[%s1371_s18 + $0x58] sm:$0xff] %vm283_vm0, %v851_v0 }
 0x11c   : > { %899 = vst.msk [vmem:[%s1371_s18 + $0xd8] sm:$0xff] %vm283_vm0, %v867_v1  ;;  %881 = vst.msk [vmem:[%s1371_s18 + $0x48] sm:$0xff] %vm283_vm0, %v849_v2  ;;  %v783_v4 = vld [vmem:[#allocation2 + $0x70] sm:$0xff] }
 0x11d   : > { %897 = vst.msk [vmem:[%s1371_s18 + $0xc8] sm:$0xff] %vm283_vm0, %v865_v3  ;;  %v799_v5 = vld [vmem:[#allocation2 + $0xf0] sm:$0xff]  ;;  %v822_v6 = vadd.f32 %v1361_v53, %v783_v4  ;;  %v781_v8 = vld [vmem:[#allocation2 + $0x60] sm:$0xff] }
 0x11e   : > { %v838_v7 = vadd.f32 %v1361_v53, %v799_v5  ;;  %v797_v9 = vld [vmem:[#allocation2 + $0xe0] sm:$0xff]  ;;  %v820_v10 = vadd.f32 %v1361_v53, %v781_v8  ;;  %v784_v12 = vld [vmem:[#allocation2 + $0x78] sm:$0xff] }
 0x11f   : > { %v836_v11 = vadd.f32 %v1361_v53, %v797_v9  ;;  %v800_v13 = vld [vmem:[#allocation2 + $0xf8] sm:$0xff]  ;;  %v854_v14 = vmax.f32 %v822_v6, 0.0  ;;  %v823_v16 = vadd.f32 %v1361_v53, %v784_v12  ;;  %v782_v18 = vld [vmem:[#allocation2 + $0x68] sm:$0xff] }
 0x120   : > { %v870_v15 = vmax.f32 %v838_v7, 0.0  ;;  %v839_v17 = vadd.f32 %v1361_v53, %v800_v13  ;;  %v798_v19 = vld [vmem:[#allocation2 + $0xe8] sm:$0xff]  ;;  %v852_v20 = vmax.f32 %v820_v10, 0.0  ;;  %v821_v22 = vadd.f32 %v1361_v53, %v782_v18 }
 0x121   : > { %v868_v21 = vmax.f32 %v836_v11, 0.0  ;;  %v837_v23 = vadd.f32 %v1361_v53, %v798_v19  ;;  %886 = vst.msk [vmem:[%s1371_s18 + $0x70] sm:$0xff] %vm283_vm0, %v854_v14  ;;  %v855_v24 = vmax.f32 %v823_v16, 0.0 }
 0x122   : > { %902 = vst.msk [vmem:[%s1371_s18 + $0xf0] sm:$0xff] %vm283_vm0, %v870_v15  ;;  %v871_v25 = vmax.f32 %v839_v17, 0.0  ;;  %884 = vst.msk [vmem:[%s1371_s18 + $0x60] sm:$0xff] %vm283_vm0, %v852_v20  ;;  %v853_v26 = vmax.f32 %v821_v22, 0.0 }
 0x123   : > { %900 = vst.msk [vmem:[%s1371_s18 + $0xe0] sm:$0xff] %vm283_vm0, %v868_v21  ;;  %v869_v27 = vmax.f32 %v837_v23, 0.0  ;;  %887 = vst.msk [vmem:[%s1371_s18 + $0x78] sm:$0xff] %vm283_vm0, %v855_v24 }
 0x124   : > { %903 = vst.msk [vmem:[%s1371_s18 + $0xf8] sm:$0xff] %vm283_vm0, %v871_v25  ;;  %885 = vst.msk [vmem:[%s1371_s18 + $0x68] sm:$0xff] %vm283_vm0, %v853_v26 }
 0x125   : > { %901 = vst.msk [vmem:[%s1371_s18 + $0xe8] sm:$0xff] %vm283_vm0, %v869_v27 }
 0x126 PF: > { %s13_s14 = sadd.s32 1, %s1227_s14   ;;  %s1502_s12 = smov %s1223_s13 }
 0x127   : > { %p10_p5 = scmp.ge.s32.totalorder %s13_s14, 4   ;;  %s1503_s13 = smov %s1505_s15 }
 0x129   :  { %12 = sbr.rel (!%p10_p5) target bundleno = 2 (0x2), region = 76 }

// kernel: _lambda_.7
= control target key start
LH: loop header
LB: loop body
LE: loop exit
PB: predicated region body
PF: predicated region fallthrough
CT: control target
= control target key end

     0   :  { %s969_s12 = smov 0   ;;  %s971_s13 = smov 0   ;;  %s1128_s0 = inlined_call_operand.vmem [shape: bf16[2,72,512], index: 0, kind: input, shape index: {}]   ;;  %s1129_s1 = inlined_call_operand.vmem [shape: bf16[2,512,32], index: 1, kind: input, shape index: {}]   ;;  %s1130_s2 = inlined_call_operand.vmem [shape: f32[2,1,32], index: 2, kind: input, shape index: {}]   ;;  %s1131_s3 = inlined_call_operand.vmem [shape: f32[2,72,32], index: 3, kind: output, shape index: {}]  }
   0x1   :  { %s973_s14 = smov 0   ;;  %s975_s15 = smov 0  }
   0x2   :  { %s977_s16 = smov 0   ;;  %s979_s17 = smov 0  }
   0x3   :  { %s981_s18 = smov 0  }
   0x4 LB: > { %s25_s19 = sadd.s32 1, %s936_s16  ;;  %s32_s20 = sadd.s32 1, %s940_s17  ;;  %s944_s18 = sphi %s981_s18, %s13_s18   ;;  %s940_s17 = sphi %s979_s17, %s1137_s17   ;;  %s936_s16 = sphi %s977_s16, %s1136_s16   ;;  %s932_s15 = sphi %s975_s15, %s1135_s15   ;;  %s928_s14 = sphi %s973_s14, %s1134_s14   ;;  %s924_s13 = sphi %s971_s13, %s1133_s13   ;;  %s920_s12 = sphi %s969_s12, %s1132_s12  }
   0x5   : > { %p26_p0 = scmp.ge.s32.totalorder %s25_s19, 4  ;;  %p50_p1 = scmp.ne.s32.totalorder %s924_s13, %s920_s12 }
   0x6   : > { %p51_p2 = scmp.eq.s32.totalorder %s944_s18, 0  ;;  %s43_s24 = sadd.s32 1, %s924_s13 }
   0x7   : > { %s1139_s19 = smov (%p26_p0, %s25_s19), 0  ;;  %s1141_s20 = smov (!%p26_p0, %s32_s20), %s940_s17 }
   0x8   : > { %p52_p3 = por %p51_p2, %p50_p1  ;;  %p34_p4 = scmp.ge.s32.totalorder %s1141_s20, 2 }
   0x9   : > { %s39_s21 = ssub.s32 %s936_s16, %s1139_s19  ;;  %p724_p6 = scmp.ge.s32.totalorder %s944_s18, 8 }
   0xa   : > { %s1143_s20 = smov (%p34_p4, %s1141_s20), 0 }
   0xb   : > { %s36_s22 = ssub.s32 %s940_s17, %s1143_s20  ;;  %158 = sbr.rel (%p724_p6) target bundleno = 31 (0x1f), region = 16 }
   0xc   : > { %s40_s23 = sor.u32 %s39_s21, %s36_s22 }
   0xd   : > { %p41_p5 = scmp.eq.s32.totalorder %s40_s23, 0 }
   0xf   : > { %s1020_s25 = scalar_select %p41_p5, %s924_s13, %s43_s24  }
  0x12   : > { %161 = sbr.rel (!%p52_p3) target bundleno = 31 (0x1f), region = 20  ;;  %s163_s26 = sand.u32 (%p52_p3), 1, %s924_s13  }
  0x13   : > { %s815_s27 = smul.u32 (%p52_p3), 36, %s940_s17 }
  0x14   : > { %s814_s28 = smul.u32 (%p52_p3), 36, %s163_s26 }
  0x15   : > { %s170_s29 = sadd.s32 (%p52_p3), %s936_s16, %s815_s27 }
  0x16   : > { %s725_s30 = sshll.u32 (%p52_p3), %s170_s29, 2  ;;  %s165_s7 = scalar_lea.vmem (%p52_p3), [#allocation3], %s814_s28 }
  0x17   : > { %s172_s6 = scalar_lea.vmem (%p52_p3), %s1128_s0, %s725_s30 }
  0x18   : > { %v188_v0 = vld [vmem:[%s172_s6] sm:$0xf] (%p52_p3)  ;;  %v190_v1 = vld [vmem:[%s172_s6 + $0x10] sm:$0xf] (%p52_p3) }
  0x19   : > { %v192_v2 = vld [vmem:[%s172_s6 + $0x20] sm:$0xf]  ;;  %189 = vst [vmem:[%s165_s7] sm:$0xf] %v188_v0  ;;  %191 = vst [vmem:[%s165_s7 + $0x4] sm:$0xf] %v190_v1 }
  0x1a   : > { %193 = vst [vmem:[%s165_s7 + $0x8] sm:$0xf] %v192_v2  ;;  %v194_v3 = vld [vmem:[%s172_s6 + $0x30] sm:$0xf]  ;;  %v196_v4 = vld [vmem:[%s172_s6 + $0x40] sm:$0xf] }
  0x1b   : > { %v198_v5 = vld [vmem:[%s172_s6 + $0x50] sm:$0xf]  ;;  %195 = vst [vmem:[%s165_s7 + $0xc] sm:$0xf] %v194_v3  ;;  %197 = vst [vmem:[%s165_s7 + $0x10] sm:$0xf] %v196_v4 }
  0x1c   : > { %199 = vst [vmem:[%s165_s7 + $0x14] sm:$0xf] %v198_v5  ;;  %v200_v6 = vld [vmem:[%s172_s6 + $0x60] sm:$0xf]  ;;  %v202_v7 = vld [vmem:[%s172_s6 + $0x70] sm:$0xf] }
  0x1d   : > { %v204_v8 = vld [vmem:[%s172_s6 + $0x80] sm:$0xf]  ;;  %201 = vst [vmem:[%s165_s7 + $0x18] sm:$0xf] %v200_v6  ;;  %203 = vst [vmem:[%s165_s7 + $0x1c] sm:$0xf] %v202_v7 }
  0x1e   : > { %205 = vst [vmem:[%s165_s7 + $0x20] sm:$0xf] %v204_v8 }
  0x1f PF: > { %p726_p7 = scmp.ge.s32.totalorder %s944_s18, 1  ;;  %p264_p8 = scmp.lt.s32.totalorder %s944_s18, 9 }
  0x21   : > { %p265_p9 = pnand %p726_p7, %p264_p8 }
  0x22   : > { %s271_s8 = sand.u32 (!%p265_p9), 1, %s920_s12   ;;  %s727_s9 = sshll.u32 (!%p265_p9), %s928_s14, 4 }
  0x23   : > { %268 = sbr.rel (%p265_p9) target bundleno = 330 (0x14a), region = 69  ;;  %p312_p10 = scmp.lt.s32.totalorder (!%p265_p9), %s932_s15, 1 }
  0x24   : > { %s816_s10 = smul.u32 (!%p265_p9), 36, %s271_s8  ;;  %p314_p11 = scmp.lt.s32.totalorder (!%p265_p9), %s727_s9, 63 }
  0x25   : > { %p731_p12 = scmp.ne.s32.totalorder (!%p265_p9), %s928_s14, 0 }
  0x26   : > { %s1053_s6 = scalar_lea.vmem (!%p265_p9), [#allocation3], %s816_s10 }
  0x2a   : > { %s1145_s15 = smov (!%p312_p10, %s932_s15), 1  ;;  %s1147_s9 = smov (!%p314_p11, %s727_s9), 63 }
  0x2b   : > { %s728_s11 = sshll.u32 %s1145_s15, 6  ;;  %s323_s23 = scalar_lea.vmem %s1130_s2, %s1145_s15  ;;  %vm339_vm0 = vcmask (!%p731_p12), 261120   ;;  %v946_v9 = vmov (!%p731_p12), 0.0  }
  0x2c   : > { %s317_s24 = sadd.s32 %s728_s11, %s1147_s9  ;;  %s817_s26 = smul.u32 72, %s1145_s15  ;;  %340 = vst.msk [vmem:[#allocation2] sm:$0xff] (!%p731_p12), %vm339_vm0, %v946_v9  ;;  %341 = vst.msk [vmem:[#allocation2 + $0x8] sm:$0xff] (!%p731_p12), %vm339_vm0, %v946_v9 }
  0x2d   : > { %s729_s27 = sshll.u32 %s317_s24, 2  ;;  %338 = sbr.rel (%p731_p12) target bundleno = 52 (0x34), region = 77  ;;  %342 = vst.msk [vmem:[#allocation2 + $0x10] sm:$0xff] (!%p731_p12), %vm339_vm0, %v946_v9  ;;  %343 = vst.msk [vmem:[#allocation2 + $0x18] sm:$0xff] (!%p731_p12), %vm339_vm0, %v946_v9 }
  0x2e   : > { %s1046_s29 = scalar_lea.vmem %s1129_s1, %s729_s27  ;;  %s1051_s5 = scalar_lea.vmem %s1131_s3, %s817_s26  ;;  %344 = vst.msk [vmem:[#allocation2 + $0x20] sm:$0xff] (!%p731_p12), %vm339_vm0, %v946_v9  ;;  %345 = vst.msk [vmem:[#allocation2 + $0x28] sm:$0xff] (!%p731_p12), %vm339_vm0, %v946_v9 }
  0x2f   : > { %346 = vst.msk [vmem:[#allocation2 + $0x30] sm:$0xff] (!%p731_p12), %vm339_vm0, %v946_v9  ;;  %347 = vst.msk [vmem:[#allocation2 + $0x38] sm:$0xff] (!%p731_p12), %vm339_vm0, %v946_v9 }
  0x30   : > { %348 = vst.msk [vmem:[#allocation2 + $0x40] sm:$0xff] (!%p731_p12), %vm339_vm0, %v946_v9 }
  0x34 PF: > { %v877_v10 = vld [vmem:[%s1046_s29] sm:$0xff]   ;;  %v947_v11 = vmov 0.0   ;;  %v878_v12 = vld [vmem:[%s1046_s29 + $0x8] sm:$0xff]   ;;  %vm948_vm1 = vmmov 0   ;;  %v879_v13 = vld [vmem:[%s1046_s29 + $0x10] sm:$0xff]   ;;  %vm540_vm2 = vcmask 261120  }
  0x35   : > { %762 = vmatprep.subr.bf16.mxu0 %v947_v11  ;;  %798 = vmatprep.subr.bf16.mxu1 %v947_v11  ;;  %v880_v14 = vld [vmem:[%s1046_s29 + $0x18] sm:$0xff]   ;;  %v881_v15 = vld [vmem:[%s1046_s29 + $0x20] sm:$0xff]   ;;  %v882_v16 = vld [vmem:[%s1046_s29 + $0x28] sm:$0xff]   ;;  %p745_p13 = scmp.ne.s32.totalorder %s928_s14, 3 }
  0x36   : > { %763 = vmatpush3.bf16.msra.mxu0 %v877_v10  ;;  %806 = vmatpush3.bf16.msra.mxu1 %v877_v10  ;;  %v883_v17 = vld [vmem:[%s1046_s29 + $0x30] sm:$0xff]   ;;  %v884_v18 = vld [vmem:[%s1046_s29 + $0x38] sm:$0xff]   ;;  %v886_v20 = vld [vmem:[%s1053_s6 + $0x18] sm:$0xff]  }
  0x37   : > { %764 = vmatprep.subr.bf16.mxu0 %v947_v11  ;;  %799 = vmatprep.subr.bf16.mxu1 %v947_v11  ;;  %v885_v19 = vld [vmem:[%s1053_s6] sm:$0xff]   ;;  %v887_v21 = vld [vmem:[%s1053_s6 + $0x8] sm:$0xff]   ;;  %v889_v23 = vld [vmem:[%s1053_s6 + $0x10] sm:$0xff]  }
  0x38   : > { %778 = vmatprep.mubr.msk.bf16.mxu0 %vm948_vm1, %v947_v11  ;;  %790 = vmatprep.mubr.msk.bf16.mxu1 %vm948_vm1, %v947_v11  ;;  %v888_v22 = vld [vmem:[%s1053_s6 + $0x20] ss:$0 sps:$4 sm:$0xff]   ;;  %v349_v24 = vld [vmem:[#allocation2] sm:$0xff]  ;;  %v355_v25 = vld [vmem:[#allocation2 + $0x30] sm:$0xff] }
  0x39   : > { %v350_v27 = vld [vmem:[#allocation2 + $0x8] sm:$0xff]  ;;  %v356_v29 = vld [vmem:[#allocation2 + $0x38] sm:$0xff]  ;;  %v351_v40 = vld [vmem:[#allocation2 + $0x10] sm:$0xff] }
  0x3a   : > { %765 = vmatpush3.bf16.msra.mxu0 %v878_v12  ;;  %807 = vmatpush3.bf16.msra.mxu1 %v878_v12  ;;  %v357_v41 = vld [vmem:[#allocation2 + $0x40] sm:$0xff]  ;;  %v352_v43 = vld [vmem:[#allocation2 + $0x18] sm:$0xff]  ;;  %v354_v56 = vld [vmem:[#allocation2 + $0x28] sm:$0xff] }
  0x3b   : > { %766 = vmatprep.subr.bf16.mxu0 %v947_v11  ;;  %800 = vmatprep.subr.bf16.mxu1 %v947_v11  ;;  %v353_v54 = vld [vmem:[#allocation2 + $0x20] sm:$0xff] }
  0x3c   : > { %v746_v63 = vld [vmem:[%s323_s23] ss:$0 sm:$0xff] (!%p745_p13) }
  0x3e   : > { %767 = vmatpush3.bf16.msra.mxu0 %v879_v13  ;;  %808 = vmatpush3.bf16.msra.mxu1 %v879_v13 }
  0x3f   : > { %768 = vmatprep.subr.bf16.mxu0 %v947_v11  ;;  %801 = vmatprep.subr.bf16.mxu1 %v947_v11 }
  0x42   : > { %769 = vmatpush3.bf16.msra.mxu0 %v880_v14  ;;  %809 = vmatpush3.bf16.msra.mxu1 %v880_v14 }
  0x43   : > { %770 = vmatprep.subr.bf16.mxu0 %v947_v11  ;;  %802 = vmatprep.subr.bf16.mxu1 %v947_v11 }
  0x46   : > { %771 = vmatpush3.bf16.msra.mxu0 %v881_v15  ;;  %810 = vmatpush3.bf16.msra.mxu1 %v881_v15 }
  0x47   : > { %772 = vmatprep.subr.bf16.mxu0 %v947_v11  ;;  %803 = vmatprep.subr.bf16.mxu1 %v947_v11 }
  0x4a   : > { %773 = vmatpush3.bf16.msra.mxu0 %v882_v16  ;;  %811 = vmatpush3.bf16.msra.mxu1 %v882_v16 }
  0x4b   : > { %774 = vmatprep.subr.bf16.mxu0 %v947_v11  ;;  %804 = vmatprep.subr.bf16.mxu1 %v947_v11 }
  0x4e   : > { %775 = vmatpush3.bf16.msra.mxu0 %v883_v17  ;;  %812 = vmatpush3.bf16.msra.mxu1 %v883_v17 }
  0x4f   : > { %776 = vmatprep.subr.bf16.mxu0 %v947_v11  ;;  %805 = vmatprep.subr.bf16.mxu1 %v947_v11 }
  0x52   : > { %777 = vmatpush3.bf16.msra.mxu0 %v884_v18  ;;  %813 = vmatpush3.bf16.msra.mxu1 %v884_v18 }
  0x55   : > { %779 = vmatmul.mubr.bf16.vlgmr.msra.gmra.mrb[0].mxu0 %v885_v19  ;;  %791 = vmatmul.mubr.bf16.vlgmr.msra.gmra.mrb[0].mxu1 %v886_v20 }
  0x56   : > { %782 = vmatprep.mubr.msk.bf16.mxu0 %vm948_vm1, %v947_v11  ;;  %794 = vmatprep.mubr.msk.bf16.mxu1 %vm948_vm1, %v947_v11 }
  0x5d   : > { %783 = vmatmul.mubr.bf16.gmra.mrb[4].mxu0 %v887_v21  ;;  %795 = vmatmul.mubr.bf16.gmra.mrb[4].mxu1 %v888_v22 }
  0x5e   : > { %786 = vmatprep.mubr.msk.bf16.mxu0 %vm948_vm1, %v947_v11 }
  0x65   : > { %787 = vmatmul.mubr.bf16.gmra.mrb[8].mxu0 %v889_v23 }
 0x128   : > { %v493_v26 = vpop.f32.mrb[0].mxu0  ;;  %v517_v28 = vpop.f32.mrb[0].mxu1 }
 0x129   : > { %v531_v30 = vadd.f32 %v493_v26, %v349_v24  ;;  %v780_v31 = vpop.f32.mrb[1].mxu0  ;;  %v537_v32 = vadd.f32 %v517_v28, %v355_v25  ;;  %v792_v33 = vpop.f32.mrb[1].mxu1 }
 0x12a   : > { %v496_v34 = vpop.f32.mrb[2].mxu0  ;;  %v520_v35 = vpop.f32.mrb[2].mxu1 }
 0x12b   : > { %541 = vst.msk [vmem:[#allocation2] sm:$0xff] %vm540_vm2, %v531_v30  ;;  %v532_v36 = vadd.f32 %v496_v34, %v350_v27  ;;  %v781_v37 = vpop.f32.mrb[3].mxu0  ;;  %547 = vst.msk [vmem:[#allocation2 + $0x30] sm:$0xff] %vm540_vm2, %v537_v32  ;;  %v538_v38 = vadd.f32 %v520_v35, %v356_v29  ;;  %v793_v39 = vpop.f32.mrb[3].mxu1 }
 0x12d   : > { %542 = vst.msk [vmem:[#allocation2 + $0x8] sm:$0xff] %vm540_vm2, %v532_v36  ;;  %548 = vst.msk [vmem:[#allocation2 + $0x38] sm:$0xff] %vm540_vm2, %v538_v38 }
 0x130   : > { %v501_v42 = vpop.f32.mrb[4].mxu0  ;;  %v525_v44 = vpop.f32.mrb[4].mxu1 }
 0x131   : > { %v533_v45 = vadd.f32 %v501_v42, %v351_v40  ;;  %v784_v46 = vpop.f32.mrb[5].mxu0  ;;  %v539_v47 = vadd.f32 %v525_v44, %v357_v41  ;;  %v796_v48 = vpop.f32.mrb[5].mxu1 }
 0x132   : > { %v504_v49 = vpop.f32.mrb[6].mxu0  ;;  %v528_v50 = vpop.f32.mrb[6].mxu1  ;;  %v554_v62 = vld [vmem:[#allocation2] sm:$0xff] (!%p745_p13)  ;;  %v560_v10 = vld [vmem:[#allocation2 + $0x30] sm:$0xff] (!%p745_p13) }
 0x133   : > { %543 = vst.msk [vmem:[#allocation2 + $0x10] sm:$0xff] %vm540_vm2, %v533_v45  ;;  %v534_v51 = vadd.f32 %v504_v49, %v352_v43  ;;  %v785_v52 = vpop.f32.mrb[7].mxu0  ;;  %549 = vst.msk [vmem:[#allocation2 + $0x40] sm:$0xff] %vm540_vm2, %v539_v47  ;;  %v797_v53 = vpop.f32.mrb[7].mxu1  ;;  %v570_v1 = vadd.f32 (!%p745_p13), %v746_v63, %v554_v62  ;;  %v576_v15 = vadd.f32 (!%p745_p13), %v746_v63, %v560_v10 }
 0x134   : > { %v555_v0 = vld [vmem:[#allocation2 + $0x8] sm:$0xff] (!%p745_p13)  ;;  %v561_v11 = vld [vmem:[#allocation2 + $0x38] sm:$0xff] (!%p745_p13) }
 0x135   : > { %544 = vst.msk [vmem:[#allocation2 + $0x18] sm:$0xff] %vm540_vm2, %v534_v51  ;;  %v571_v2 = vadd.f32 (!%p745_p13), %v746_v63, %v555_v0  ;;  %v579_v12 = vmax.f32 (!%p745_p13), %v570_v1, 0.0  ;;  %v577_v20 = vadd.f32 (!%p745_p13), %v746_v63, %v561_v11  ;;  %v585_v22 = vmax.f32 (!%p745_p13), %v576_v15, 0.0 }
 0x137   : > { %553 = sbr.rel (%p745_p13) target bundleno = 330 (0x14a), region = 81  ;;  %v580_v13 = vmax.f32 (!%p745_p13), %v571_v2, 0.0  ;;  %588 = vst.msk [vmem:[%s1051_s5] sm:$0xff] (!%p745_p13), %vm540_vm2, %v579_v12  ;;  %v586_v24 = vmax.f32 (!%p745_p13), %v577_v20, 0.0  ;;  %594 = vst.msk [vmem:[%s1051_s5 + $0x30] sm:$0xff] (!%p745_p13), %vm540_vm2, %v585_v22 }
 0x138   : > { %v509_v55 = vpop.f32.mrb[8].mxu0 }
 0x139   : > { %v535_v57 = vadd.f32 %v509_v55, %v353_v54  ;;  %v788_v58 = vpop.f32.mrb[9].mxu0  ;;  %589 = vst.msk [vmem:[%s1051_s5 + $0x8] sm:$0xff] (!%p745_p13), %vm540_vm2, %v580_v13  ;;  %595 = vst.msk [vmem:[%s1051_s5 + $0x38] sm:$0xff] (!%p745_p13), %vm540_vm2, %v586_v24 }
 0x13a   : > { %v512_v59 = vpop.f32.mrb[10].mxu0  ;;  %v556_v3 = vld [vmem:[#allocation2 + $0x10] sm:$0xff] (!%p745_p13)  ;;  %v562_v16 = vld [vmem:[#allocation2 + $0x40] sm:$0xff] (!%p745_p13) }
 0x13b   : > { %545 = vst.msk [vmem:[#allocation2 + $0x20] sm:$0xff] %vm540_vm2, %v535_v57  ;;  %v536_v60 = vadd.f32 %v512_v59, %v354_v56  ;;  %v789_v61 = vpop.f32.mrb[11].mxu0  ;;  %v572_v6 = vadd.f32 (!%p745_p13), %v746_v63, %v556_v3  ;;  %v578_v23 = vadd.f32 (!%p745_p13), %v746_v63, %v562_v16 }
 0x13c   : > { %v557_v4 = vld [vmem:[#allocation2 + $0x18] sm:$0xff] (!%p745_p13) }
 0x13d   : > { %546 = vst.msk [vmem:[#allocation2 + $0x28] sm:$0xff] %vm540_vm2, %v536_v60  ;;  %v573_v7 = vadd.f32 (!%p745_p13), %v746_v63, %v557_v4  ;;  %v581_v17 = vmax.f32 (!%p745_p13), %v572_v6, 0.0  ;;  %v587_v25 = vmax.f32 (!%p745_p13), %v578_v23, 0.0 }
 0x13f   : > { %v582_v18 = vmax.f32 %v573_v7, 0.0  ;;  %590 = vst.msk [vmem:[%s1051_s5 + $0x10] sm:$0xff] %vm540_vm2, %v581_v17  ;;  %596 = vst.msk [vmem:[%s1051_s5 + $0x40] sm:$0xff] %vm540_vm2, %v587_v25 }
 0x141   : > { %591 = vst.msk [vmem:[%s1051_s5 + $0x18] sm:$0xff] %vm540_vm2, %v582_v18 }
 0x142   : > { %v558_v5 = vld [vmem:[#allocation2 + $0x20] sm:$0xff] }
 0x143   : > { %v574_v8 = vadd.f32 %v746_v63, %v558_v5 }
 0x144   : > { %v559_v9 = vld [vmem:[#allocation2 + $0x28] sm:$0xff] }
 0x145   : > { %v575_v14 = vadd.f32 %v746_v63, %v559_v9  ;;  %v583_v19 = vmax.f32 %v574_v8, 0.0 }
 0x147   : > { %v584_v21 = vmax.f32 %v575_v14, 0.0  ;;  %592 = vst.msk [vmem:[%s1051_s5 + $0x20] sm:$0xff] %vm540_vm2, %v583_v19 }
 0x149   : > { %593 = vst.msk [vmem:[%s1051_s5 + $0x28] sm:$0xff] %vm540_vm2, %v584_v21 }
 0x14a PF: > { %s13_s18 = sadd.s32 1, %s944_s18   ;;  %s1132_s12 = smov %s924_s13 }
 0x14b   : > { %p10_p0 = scmp.ge.s32.totalorder %s13_s18, 10   ;;  %s1133_s13 = smov %s1020_s25 }
 0x14c   : > { %s1134_s14 = smov %s936_s16  ;;  %s1135_s15 = smov %s940_s17 }
 0x14d   : > { %s1136_s16 = smov %s1139_s19  ;;  %s1137_s17 = smov %s1143_s20 }
 0x14e   :  { %12 = sbr.rel (!%p10_p0) target bundleno = 4 (0x4), region = 122 }

// kernel: _lambda_.8
= control target key start
LH: loop header
LB: loop body
LE: loop exit
PB: predicated region body
PF: predicated region fallthrough
CT: control target
= control target key end

     0   :  { %s551_s15 = smov 0   ;;  %s597_s0 = inlined_call_operand.vmem [shape: f32[2,3,3,64], index: 0, kind: input, shape index: {}]   ;;  %s598_s1 = inlined_call_operand.vmem [shape: f32[2,3,2,64], index: 1, kind: input, shape index: {}]   ;;  %s599_s2 = inlined_call_operand.vmem [shape: f32[2,2,3,64], index: 2, kind: input, shape index: {}]   ;;  %s600_s3 = inlined_call_operand.vmem [shape: f32[2,2,2,64], index: 3, kind: input, shape index: {}]   ;;  %s601_s4 = inlined_call_operand.vmem [shape: f32[2,2,2,64], index: 4, kind: output, shape index: {}]  }
   0x1 LB: > { %s472_s16 = sadd.s32 4294967295, %s519_s15   ;;  %p476_p0 = scmp.ge.s32.totalorder %s519_s15, 1  ;;  %s519_s15 = sphi %s551_s15, %s14_s15  }
   0x2   : > { %p192_p1 = scmp.lt.s32.totalorder %s519_s15, 3 }
   0x4   : > { %p193_p2 = pnand %p476_p0, %p192_p1 }
   0x5   : > { %p233_p3 = scmp.lt.s32.totalorder (!%p193_p2), %s472_s16, 1  ;;  %s521_s7 = smov (!%p193_p2), 64   ;;  %vm303_vm0 = vcmask (!%p193_p2), 1048064   ;;  %v301_v41 = vlaneseq (!%p193_p2)  ;;  %vm378_vm5 = vcmask (!%p193_p2), 517120  }
   0x6   : > { %196 = sbr.rel (%p193_p2) target bundleno = 437 (0x1b5), region = 36  ;;  %s522_s8 = smov (!%p193_p2), 127  }
   0x7   : > { %s523_s9 = smov (!%p193_p2), 65   ;;  %s524_s10 = smov (!%p193_p2), 126   ;;  %v302_v42 = vand.u32 (!%p193_p2), 127, %v301_v41 }
   0x8   : > { %s525_s11 = smov (!%p193_p2), 66  }
   0x9   : > { %vm316_vm1 = vcmp.lt.s32.totalorder (!%p193_p2), %v302_v42, 63  ;;  %vm329_vm2 = vcmp.ge.s32.totalorder (!%p193_p2), %v302_v42, 1  ;;  %vm340_vm3 = vcmp.lt.s32.totalorder (!%p193_p2), %v302_v42, 62  ;;  %vm351_vm4 = vcmp.ge.s32.totalorder (!%p193_p2), %v302_v42, 2 }
   0xd   : > { %s603_s16 = smov (!%p233_p3, %s472_s16), 1 }
   0xe   : > { %s490_s17 = smul.u32 12, %s603_s16  ;;  %s488_s21 = sshll.u32 %s603_s16, 2 }
   0xf   : > { %s491_s22 = smul.u32 6, %s603_s16  ;;  %s252_s25 = scalar_lea.vmem %s600_s3, %s488_s21 }
  0x10   : > { %s237_s20 = scalar_lea.vmem %s597_s0, %s490_s17  ;;  %v266_v2 = vld [vmem:[%s252_s25] sm:$0x3]  ;;  %s487_s26 = sshll.u32 %s603_s16, 3  ;;  %v267_v7 = vld [vmem:[%s252_s25 + $0x2] sm:$0x3] }
  0x11   : > { %v258_v0 = vld [vmem:[%s237_s20] sm:$0x7]  ;;  %v259_v1 = vld [vmem:[%s237_s20 + $0x4] sm:$0x7]  ;;  %v260_v6 = vld [vmem:[%s237_s20 + $0x8] sm:$0x7]  ;;  %s242_s29 = scalar_lea.vmem %s598_s1, %s491_s22  ;;  %s247_s6 = scalar_lea.vmem %s599_s2, %s487_s26 }
  0x12   : > { %v268_v3 = vmax.f32 %v266_v2, %v258_v0  ;;  %v272_v4 = vrot.slane %v258_v0, 1  ;;  %v273_v5 = vrot.slane %v259_v1, 1  ;;  %v269_v9 = vmax.f32 %v267_v7, %v259_v1  ;;  %v261_v13 = vld [vmem:[%s242_s29] sm:$0x3]  ;;  %v262_v16 = vld [vmem:[%s242_s29 + $0x2] sm:$0x3]  ;;  %s257_s14 = scalar_lea.vmem %s601_s4, %s488_s21 }
  0x13   : > { %v281_v12 = vrot.slane %v260_v6, 1  ;;  %v264_v17 = vld [vmem:[%s247_s6] sm:$0x7]  ;;  %v263_v20 = vld [vmem:[%s242_s29 + $0x4] sm:$0x3] }
  0x14   : > { %v276_v8 = vmax.f32 %v268_v3, %v272_v4  ;;  %v277_v11 = vmax.f32 %v269_v9, %v273_v5  ;;  %v265_v21 = vld [vmem:[%s247_s6 + $0x4] sm:$0x7]  ;;  %v293_v23 = vrot.slane %v264_v17, 1 }
  0x15   : > { %v294_v27 = vrot.slane %v265_v21, 1 }
  0x16   : > { %v278_v10 = vmax.f32 %v276_v8, %v259_v1  ;;  %v279_v15 = vmax.f32 %v277_v11, %v260_v6 }
  0x18   : > { %v283_v14 = vmax.f32 %v278_v10, %v273_v5  ;;  %v284_v19 = vmax.f32 %v279_v15, %v281_v12 }
  0x1a   : > { %v285_v18 = vmax.f32 %v283_v14, %v261_v13  ;;  %v286_v24 = vmax.f32 %v284_v19, %v262_v16 }
  0x1c   : > { %v287_v22 = vmax.f32 %v285_v18, %v262_v16  ;;  %v288_v26 = vmax.f32 %v286_v24, %v263_v20 }
  0x1e   : > { %v289_v25 = vmax.f32 %v287_v22, %v264_v17  ;;  %v290_v29 = vmax.f32 %v288_v26, %v265_v21 }
  0x20   : > { %v579_v28 = vmax.f32 %v289_v25, %v293_v23  ;;  %v583_v31 = vmax.f32 %v290_v29, %v294_v27 }
  0x22   : > { %v299_v30 = vmul.f32 %v579_v28, %v579_v28  ;;  %v300_v32 = vmul.f32 %v583_v31, %v583_v31 }
  0x24   : > { %304 = vrot.lane.b32.xlu0 %v299_v30, %s521_s7 }
  0x28   : > { %307 = vrot.lane.b32.xlu0 %v300_v32, %s521_s7 }
  0x96   : > { %v305_v33 = vpop.permute.xlu0 %304 }
  0x97   : > { %v306_v34 = vsel %vm303_vm0, %v305_v33, %v299_v30 }
  0x98   : > { %310 = vrot.lane.b32.xlu1 %v306_v34, %s521_s7 }
  0x9a   : > { %v308_v35 = vpop.permute.xlu0 %307 }
  0x9b   : > { %v309_v36 = vsel %vm303_vm0, %v308_v35, %v300_v32 }
  0x9c   : > { %312 = vrot.lane.b32.xlu1 %v309_v36, %s521_s7 }
 0x10a   : > { %v311_v37 = vpop.permute.xlu1 %310 }
 0x10b   : > { %v314_v38 = vsel %vm303_vm0, %v311_v37, %v299_v30 }
 0x10c   : > { %319 = vrot.lane.b32.xlu0 %v314_v38, %s522_s8 }
 0x10e   : > { %v313_v39 = vpop.permute.xlu1 %312 }
 0x10f   : > { %v315_v40 = vsel %vm303_vm0, %v313_v39, %v300_v32 }
 0x110   : > { %330 = vrot.lane.b32.xlu0 %v314_v38, %s523_s9  ;;  %321 = vrot.lane.b32.xlu1 %v315_v40, %s522_s8 }
 0x114   : > { %341 = vrot.lane.b32.xlu0 %v314_v38, %s524_s10  ;;  %332 = vrot.lane.b32.xlu1 %v315_v40, %s523_s9 }
 0x118   : > { %352 = vrot.lane.b32.xlu0 %v314_v38, %s525_s11  ;;  %343 = vrot.lane.b32.xlu1 %v315_v40, %s524_s10 }
 0x11c   : > { %354 = vrot.lane.b32.xlu1 %v315_v40, %s525_s11 }
 0x17e   : > { %v320_v43 = vpop.permute.xlu0 %319 }
 0x17f   : > { %v325_v46 = vsel %vm316_vm1, %v320_v43, 0.0 }
 0x180   : > { %v327_v48 = vadd.f32 %v325_v46, %v299_v30 }
 0x182   : > { %v322_v44 = vpop.permute.xlu1 %321  ;;  %v331_v45 = vpop.permute.xlu0 %330 }
 0x183   : > { %v336_v47 = vsel %vm329_vm2, %v331_v45, 0.0  ;;  %v326_v51 = vsel %vm316_vm1, %v322_v44, 0.0 }
 0x184   : > { %v338_v53 = vadd.f32 %v336_v47, %v327_v48  ;;  %v328_v55 = vadd.f32 %v326_v51, %v300_v32 }
 0x186   : > { %v333_v49 = vpop.permute.xlu1 %332  ;;  %v342_v50 = vpop.permute.xlu0 %341 }
 0x187   : > { %v347_v52 = vsel %vm340_vm3, %v342_v50, 0.0  ;;  %v337_v54 = vsel %vm329_vm2, %v333_v49, 0.0 }
 0x188   : > { %v349_v56 = vadd.f32 %v347_v52, %v338_v53  ;;  %v339_v61 = vadd.f32 %v337_v54, %v328_v55 }
 0x18a   : > { %v344_v57 = vpop.permute.xlu1 %343  ;;  %v353_v58 = vpop.permute.xlu0 %352 }
 0x18b   : > { %v348_v59 = vsel %vm340_vm3, %v344_v57, 0.0  ;;  %v358_v60 = vsel %vm351_vm4, %v353_v58, 0.0 }
 0x18c   : > { %v360_v62 = vadd.f32 %v358_v60, %v349_v56  ;;  %v350_v63 = vadd.f32 %v348_v59, %v339_v61 }
 0x18e   : > { %v362_v0 = vmul.f32 2e-05, %v360_v62  ;;  %v355_v1 = vpop.permute.xlu1 %354 }
 0x18f   : > { %v359_v2 = vsel %vm351_vm4, %v355_v1, 0.0 }
 0x190   : > { %v364_v3 = vadd.f32 1.0, %v362_v0  ;;  %v361_v4 = vadd.f32 %v359_v2, %v350_v63 }
 0x192   : > { %505 = vlog2.f32 %v364_v3  ;;  %v363_v5 = vmul.f32 2e-05, %v361_v4 }
 0x194   : > { %v365_v6 = vadd.f32 1.0, %v363_v5 }
 0x196   : > { %507 = vlog2.f32 %v365_v6 }
 0x19c   : > { %v506_v7 = vpop.eup %505 }
 0x19d   : > { %v367_v8 = vmul.f32 0.6931472, %v506_v7 }
 0x19f   : > { %v370_v9 = vmul.f32 -0.75, %v367_v8 }
 0x1a0   : > { %v508_v10 = vpop.eup %507 }
 0x1a1   : > { %v372_v11 = vmul.f32 1.442695, %v370_v9  ;;  %v369_v12 = vmul.f32 0.6931472, %v508_v10 }
 0x1a3   : > { %509 = vpow2.f32 %v372_v11  ;;  %v371_v13 = vmul.f32 -0.75, %v369_v12 }
 0x1a5   : > { %v374_v14 = vmul.f32 1.442695, %v371_v13 }
 0x1a7   : > { %511 = vpow2.f32 %v374_v14 }
 0x1ad   : > { %v510_v15 = vpop.eup %509 }
 0x1ae   : > { %v376_v16 = vmul.f32 %v510_v15, %v579_v28 }
 0x1b0   : > { %379 = vst.msk [vmem:[%s257_s14] sm:$0x3] %vm378_vm5, %v376_v16 }
 0x1b1   : > { %v512_v17 = vpop.eup %511 }
 0x1b2   : > { %v377_v18 = vmul.f32 %v512_v17, %v583_v31 }
 0x1b4   : > { %380 = vst.msk [vmem:[%s257_s14 + $0x2] sm:$0x3] %vm378_vm5, %v377_v18 }
 0x1b5 PF: > { %s14_s15 = sadd.s32 1, %s519_s15  }
 0x1b6   : > { %p11_p4 = scmp.ge.s32.totalorder %s14_s15, 4  }
 0x1b8   :  { %13 = sbr.rel (!%p11_p4) target bundleno = 1 (0x1), region = 75 }

// kernel: _lambda_.9
= control target key start
LH: loop header
LB: loop body
LE: loop exit
PB: predicated region body
PF: predicated region fallthrough
CT: control target
= control target key end

     0   :  { %s829_s18 = smov 0   ;;  %s831_s19 = smov 0   ;;  %s905_s0 = inlined_call_operand.vmem [shape: bf16[1,8,640], index: 0, kind: input, shape index: {}]   ;;  %s906_s1 = inlined_call_operand.vmem [shape: bf16[1,640,32], index: 1, kind: input, shape index: {}]   ;;  %s907_s2 = inlined_call_operand.vmem [shape: f32[1,1,32], index: 2, kind: input, shape index: {}]   ;;  %s908_s3 = inlined_call_operand.vmem [shape: f32[32,16], index: 3, kind: input, shape index: {}]   ;;  %s909_s4 = inlined_call_operand.vmem [shape: f32[1,16], index: 4, kind: input, shape index: {}]   ;;  %s910_s5 = inlined_call_operand.vmem [shape: f32[1,8,16], index: 5, kind: output, shape index: {}]  }
   0x1   :  { %s833_s20 = smov 0  }
   0x2 LB: > { %s27_s21 = sadd.s32 1, %s787_s19  ;;  %p660_p0 = scmp.ge.s32.totalorder %s791_s20, 1  ;;  %s791_s20 = sphi %s833_s20, %s15_s20   ;;  %s787_s19 = sphi %s831_s19, %s912_s19   ;;  %s783_s18 = sphi %s829_s18, %s911_s18  }
   0x3   : > { %p28_p1 = scmp.ge.s32.totalorder %s27_s21, 5  ;;  %p244_p2 = scmp.lt.s32.totalorder %s791_s20, 6 }
   0x5   : > { %s914_s21 = smov (%p28_p1, %s27_s21), 0  ;;  %p245_p3 = pnand %p660_p0, %p244_p2 }
   0x6   : > { %p297_p4 = scmp.lt.s32.totalorder (!%p245_p3), %s783_s18, 4  ;;  %s662_s22 = sshll.u32 (!%p245_p3), %s783_s18, 4 }
   0x7   : > { %248 = sbr.rel (%p245_p3) target bundleno = 498 (0x1f2), region = 40  ;;  %p308_p5 = scmp.lt.s32.totalorder (!%p245_p3), %s662_s22, 79 }
   0x8   : > { %p664_p6 = scmp.ne.s32.totalorder (!%p245_p3), %s783_s18, 0 }
   0xe   : > { %s298_s23 = scalar_select %p297_p4, %s783_s18, 4 }
   0xf   : > { %s916_s22 = smov (!%p308_p5, %s662_s22), 79  ;;  %329 = sbr.rel (%p664_p6) target bundleno = 22 (0x16), region = 44 }
  0x10   : > { %s661_s24 = sshll.u32 %s298_s23, 2  ;;  %s663_s28 = sshll.u32 %s916_s22, 2  ;;  %vm330_vm0 = vcmask (!%p664_p6), 261120   ;;  %v793_v0 = vmov (!%p664_p6), 0.0  }
  0x11   : > { %s855_s27 = scalar_lea.vmem %s905_s0, %s661_s24  ;;  %s860_s6 = scalar_lea.vmem %s906_s1, %s663_s28  ;;  %331 = vst.msk [vmem:[#allocation2] sm:$0xff] (!%p664_p6), %vm330_vm0, %v793_v0 }
  0x16 PF: > { %v761_v1 = vld [vmem:[%s860_s6] sm:$0xff]   ;;  %v794_v2 = vmov 0.0   ;;  %v762_v3 = vld [vmem:[%s860_s6 + $0x8] sm:$0xff]   ;;  %vm795_vm1 = vmmov 0   ;;  %v763_v4 = vld [vmem:[%s860_s6 + $0x10] sm:$0xff]   ;;  %vm439_vm2 = vcmask 261120  }
  0x17   : > { %694 = vmatprep.subr.bf16.mxu0 %v794_v2  ;;  %710 = vmatprep.mubr.msk.bf16.mxu0 %vm795_vm1, %v794_v2  ;;  %v764_v5 = vld [vmem:[%s860_s6 + $0x18] sm:$0xff]   ;;  %v765_v6 = vld [vmem:[%s860_s6 + $0x20] sm:$0xff]   ;;  %v766_v7 = vld [vmem:[%s860_s6 + $0x28] sm:$0xff]   ;;  %p673_p7 = scmp.ne.s32.totalorder %s783_s18, 4 }
  0x18   : > { %695 = vmatpush3.bf16.msra.mxu0 %v761_v1  ;;  %v767_v8 = vld [vmem:[%s860_s6 + $0x30] sm:$0xff]   ;;  %v768_v9 = vld [vmem:[%s860_s6 + $0x38] sm:$0xff]   ;;  %v333_v10 = vld [vmem:[%s855_s27] sm:$0xf]  ;;  %v796_v20 = vmov (!%p673_p7), 0.0|0.0   ;;  %vm797_vm3 = vmmov (!%p673_p7), 0  }
  0x19   : > { %696 = vmatprep.subr.bf16.mxu0 %v794_v2  ;;  %v332_v11 = vld [vmem:[#allocation2] sm:$0xff]  ;;  %v456_v18 = vld [vmem:[%s908_s3 + $0x8] sm:$0xff] (!%p673_p7)  ;;  %v457_v19 = vld [vmem:[%s908_s3 + $0x10] sm:$0xff] (!%p673_p7)  ;;  %v798_v23 = vmov (!%p673_p7), 0.0   ;;  %vm540_vm4 = vcmask (!%p673_p7), 130048  }
  0x1a   : > { %v455_v17 = vld [vmem:[%s908_s3] sm:$0xff] (!%p673_p7)  ;;  %v458_v22 = vld [vmem:[%s908_s3 + $0x18] sm:$0xff] (!%p673_p7) }
  0x1b   : > { %v726_v21 = vpack.c.bf16 (!%p673_p7), %v456_v18, %v455_v17  ;;  %v674_v25 = vld [vmem:[%s907_s2] ss:$0 sm:$0xff] (!%p673_p7)  ;;  %v729_v27 = vpack.c.bf16 (!%p673_p7), %v458_v22, %v457_v19 }
  0x1c   : > { %697 = vmatpush3.bf16.msra.mxu0 %v762_v3  ;;  %v675_v29 = vld [vmem:[%s909_s4] ss:$0 sm:$0xff] (!%p673_p7) }
  0x1d   : > { %698 = vmatprep.subr.bf16.mxu0 %v794_v2 }
  0x20   : > { %699 = vmatpush3.bf16.msra.mxu0 %v763_v4 }
  0x21   : > { %700 = vmatprep.subr.bf16.mxu0 %v794_v2 }
  0x24   : > { %701 = vmatpush3.bf16.msra.mxu0 %v764_v5 }
  0x25   : > { %702 = vmatprep.subr.bf16.mxu0 %v794_v2 }
  0x28   : > { %703 = vmatpush3.bf16.msra.mxu0 %v765_v6 }
  0x29   : > { %704 = vmatprep.subr.bf16.mxu0 %v794_v2 }
  0x2c   : > { %705 = vmatpush3.bf16.msra.mxu0 %v766_v7 }
  0x2d   : > { %706 = vmatprep.subr.bf16.mxu0 %v794_v2 }
  0x30   : > { %707 = vmatpush3.bf16.msra.mxu0 %v767_v8 }
  0x31   : > { %708 = vmatprep.subr.bf16.mxu0 %v794_v2 }
  0x34   : > { %709 = vmatpush3.bf16.msra.mxu0 %v768_v9 }
  0x35   : > { %725 = vmatprep.subr.bf16.mxu0 (!%p673_p7), %v796_v20 }
  0x37   : > { %711 = vmatmul.mubr.bf16.vlgmr.msra.gmra.mrb[0].mxu0 %v333_v10 }
  0x38   : > { %722 = vmatprep.mubr.msk.f32.mxu0 (!%p673_p7), %vm797_vm3, %v798_v23  ;;  %727 = vmatpush3.bf16.msra.mxu0 (!%p673_p7), %v726_v21 }
  0x39   : > { %728 = vmatprep.subr.bf16.mxu0 (!%p673_p7), %v796_v20 }
  0x3c   : > { %730 = vmatpush3.bf16.msra.mxu0 (!%p673_p7), %v729_v27 }
 0x107   : > { %444 = sbr.rel (%p673_p7) target bundleno = 498 (0x1f2), region = 48 }
 0x10a   : > { %v432_v12 = vpop.f32.mrb[0].mxu0 }
 0x10b   : > { %v438_v13 = vadd.f32 %v432_v12, %v332_v11  ;;  %v712_v14 = vpop.f32.mrb[1].mxu0 }
 0x10c   : > { %v435_v15 = vpop.f32.mrb[2].mxu0 }
 0x10d   : > { %440 = vst.msk [vmem:[#allocation2] sm:$0xff] %vm439_vm2, %v438_v13  ;;  %v713_v16 = vpop.f32.mrb[3].mxu0 }
 0x114   : > { %v445_v24 = vld [vmem:[#allocation2] sm:$0xff] }
 0x115   : > { %v453_v26 = vadd.f32 %v674_v25, %v445_v24 }
 0x117   : > { %v454_v28 = vmax.f32 %v453_v26, 0.0 }
 0x119   : > { %723 = vmatmul.mubr.msk.f32.vlgmr.msra.gmra.mrb[0].mxu0 %vm439_vm2, %v454_v28 }
 0x1ec   : > { %v535_v30 = vpop.f32.mrb[0].mxu0 }
 0x1ed   : > { %v536_v31 = vadd.f32 %v675_v29, %v535_v30  ;;  %v724_v32 = vpop.f32.mrb[1].mxu0 }
 0x1ef   : > { %v539_v33 = vmax.f32 %v536_v31, 0.0 }
 0x1f1   : > { %541 = vst.msk [vmem:[%s910_s5] sm:$0xff] %vm540_vm4, %v539_v33 }
 0x1f2 PF: > { %s15_s20 = sadd.s32 1, %s791_s20   ;;  %s911_s18 = smov %s787_s19 }
 0x1f3   : > { %p12_p8 = scmp.ge.s32.totalorder %s15_s20, 7   ;;  %s912_s19 = smov %s914_s21 }
 0x1f5   :  { %14 = sbr.rel (!%p12_p8) target bundleno = 2 (0x2), region = 84 }

</bundles_post_ra>
